<compile_context>
chip_gen: v7x
topology: tpu7x:2x2x1
jax: 0.10.0
libtpu: 0.0.40
codegen_flags: <defaults>
</compile_context>

<pallas_src>
import functools

import jax
import jax.numpy as jnp
from jax.experimental import pallas as pl
from jax.experimental.pallas import tpu as pltpu


def _round_up(x, m):
    return -(-x // m) * m


# ----------------------------------------------------------------------------
# Pallas kernel: (conv1x1 + BN + ReLU) x2 -> conv1x1 -> max over K
#                -> BN1d(scale, shift) + ReLU, all channels-first.
# ----------------------------------------------------------------------------
def _sablock_kernel(x_ref, w_ref, p_ref, o_ref, *, c1, c2):
    """Layouts:
       x_ref : (1, K, CIN_P, TM)  gathered features, channels on sublanes
       w_ref : (3, RMAX, CMAX)    stacked conv weights (BN1/BN2 scale folded)
       p_ref : (RMAX, 4)          packed columns [b1 | b2 | bn_scale | bn_shift]
       o_ref : (1, COUT, TM)      output block, already in (B, C, M) layout
    """
    _, k, cin_p, tm = x_ref.shape
    cout = o_ref.shape[1]

    w_all = w_ref[...]
    p_all = p_ref[...]
    w1 = w_all[0, :c1, :cin_p]          # (C1, CIN_P)
    w2 = w_all[1, :c2, :c1]             # (C2, C1)
    w3 = w_all[2, :cout, :c2]           # (COUT, C2)
    b1 = p_all[:c1, 0:1]                # (C1, 1) — broadcasts over lanes
    b2 = p_all[:c2, 1:2]
    sn = p_all[:cout, 2:3]              # final BN1d scale (NOT folded into w3:
    bn = p_all[:cout, 3:4]              #  it sits across the max-over-K)

    # Max over K neighbors == elementwise max of K small transposed matmul
    # chains; each x_ref[0, j] is a free major-dim view (CIN_P, TM).
    acc = jnp.full((cout, tm), -jnp.inf, dtype=jnp.float32)
    for j in range(k):                  # static unroll — K is small
        xj = x_ref[0, j, :, :]          # (CIN_P, TM)
        h = jnp.dot(w1, xj, preferred_element_type=jnp.float32)
        h = jnp.maximum(h + b1, 0.0)
        h = jnp.dot(w2, h, preferred_element_type=jnp.float32)
        h = jnp.maximum(h + b2, 0.0)
        h = jnp.dot(w3, h, preferred_element_type=jnp.float32)     # (COUT, TM)
        acc = jnp.maximum(acc, h)

    o_ref[0, :, :] = jnp.maximum(acc * sn + bn, 0.0)


def sablock_pallas(feats, wstack, pvec, dims, *, tm):
    """feats: (B, K, CIN_P, M_pad) f32 -> (B, COUT, M_pad) f32."""
    cin_p, c1, c2, cout = dims
    b, k, cp, m_pad = feats.shape
    assert cp == cin_p and m_pad % tm == 0

    kernel = functools.partial(_sablock_kernel, c1=c1, c2=c2)
    return pl.pallas_call(
        kernel,
        out_shape=jax.ShapeDtypeStruct((b, cout, m_pad), jnp.float32),
        grid_spec=pltpu.PrefetchScalarGridSpec(
            num_scalar_prefetch=0,
            grid=(b, m_pad // tm),
            in_specs=[
                pl.BlockSpec((1, k, cin_p, tm), lambda bi, mi: (bi, 0, 0, mi)),
                pl.BlockSpec(wstack.shape, lambda bi, mi: (0, 0, 0)),
                pl.BlockSpec(pvec.shape, lambda bi, mi: (0, 0)),
            ],
            out_specs=pl.BlockSpec((1, cout, tm), lambda bi, mi: (bi, 0, mi)),
        ),
        compiler_params=pltpu.CompilerParams(
            dimension_semantics=("parallel", "parallel"),
            vmem_limit_bytes=32 * 1024 * 1024),
    )(feats, wstack, pvec)


# ----------------------------------------------------------------------------
# Glue (plain JAX): ball query + channels-first gather
# ----------------------------------------------------------------------------
def ball_query(src_xyz, query_xyz, radius, k):
    """src_xyz: (B,3,N), query_xyz: (B,3,M) -> neighbor idx (B,M,K) int32.

    First k source points (index order) within `radius`; missing slots padded
    with the first in-radius point; empty balls fall back to the nearest point.
    """
    src = jnp.transpose(src_xyz, (0, 2, 1))    # (B, N, 3)
    qry = jnp.transpose(query_xyz, (0, 2, 1))  # (B, M, 3)
    n = src.shape[1]
    d2 = jnp.sum((qry[:, :, None, :] - src[:, None, :, :]) ** 2, axis=-1)  # (B,M,N)
    within = d2 < radius ** 2
    order = jnp.where(within, jnp.arange(n)[None, None, :], n)
    idx = jnp.sort(order, axis=-1)[..., :k]
    valid = jnp.arange(k)[None, None, :] < within.sum(-1, keepdims=True)
    idx = jnp.where(valid, idx, idx[..., :1])
    nearest = jnp.argmin(d2, axis=-1)[..., None]
    idx = jnp.where(within.any(-1, keepdims=True), idx, nearest)
    return jnp.clip(idx, 0, n - 1).astype(jnp.int32)


def gather_cf(x, idx):
    """x: (B, D, N), idx: (B, M, K) -> (B, K, D, M) channels-first gather.

    The gather itself runs with a lane-dense (D, K*M) minor dim; only a small
    major-dim transpose remains to present the (K, D, M) per-batch layout.
    """
    b, m, k = idx.shape
    idx_km = jnp.transpose(idx, (0, 2, 1)).reshape(b, k * m)       # (B, K*M)

    def one(xb, ib):
        g = jnp.take(xb, ib, axis=1)           # (D, K*M), lane-dense
        g = g.reshape(g.shape[0], k, m)        # (D, K, M) — free minor split
        return jnp.transpose(g, (1, 0, 2))     # (K, D, M) — major-dim swap

    return jax.vmap(one)(x, idx_km)


def route_cf(src_x, src_xyz, xyz, radius, k, cin_p):
    """Gathered neighborhood features, channels-first: (B, K, CIN_P, M) f32."""
    idx = ball_query(src_xyz, xyz, radius, k)                    # (B, M, K)
    nx = gather_cf(src_x, idx)                                   # (B, K, C, M)
    nxyz = gather_cf(src_xyz, idx) - xyz[:, None, :, :]          # (B, K, 3, M)
    parts = [nx, nxyz]
    cin = nx.shape[2] + 3
    if cin_p > cin:                                              # fold the channel pad
        b, _, _, m = nx.shape                                    # into the concat (one
        parts.append(jnp.zeros((b, k, cin_p - cin, m), nx.dtype))  # HBM pass, not two)
    feats = jnp.concatenate(parts, axis=2)                       # (B, K, CIN_P, M)
    return feats, idx


# ----------------------------------------------------------------------------
# Parameter preparation (fold BN scales, pack operands)
# ----------------------------------------------------------------------------
def fold_bn(gamma, beta, mean, var, eps=1e-5):
    scale = gamma * jax.lax.rsqrt(var + eps)
    shift = beta - mean * scale
    return scale, shift


def prepare_params(w1, bn1, w2, bn2, w3, bnn, *, cin, eps=1e-5):
    """Conv weights in PyTorch orientation (C_out, C_in).  Folds the two
    pre-ReLU BatchNorm2d scales into w1/w2 and packs everything into two small
    arrays so the kernel pipeline handles 3 operands instead of 8."""
    (g1, a1, m1, v1), (g2, a2, m2, v2), (gn, an, mn, vn) = bn1, bn2, bnn
    s1, b1 = fold_bn(g1, a1, m1, v1, eps)
    s2, b2 = fold_bn(g2, a2, m2, v2, eps)
    sn, bn = fold_bn(gn, an, mn, vn, eps)

    c1, c2, cout = w1.shape[0], w2.shape[0], w3.shape[0]
    cin_p = _round_up(cin, 8)                  # f32 sublane tile
    w1f = w1 * s1[:, None]
    w2f = w2 * s2[:, None]
    # NOTE: sn is NOT folded into w3 — it sits across the max-over-K.

    rmax = max(c1, c2, cout)
    cmax = max(cin_p, c1, c2)

    def pad2(w):
        return jnp.pad(w, ((0, rmax - w.shape[0]), (0, cmax - w.shape[1])))

    def pad1(v):
        return jnp.pad(v, (0, rmax - v.shape[0]))

    wstack = jnp.stack([pad2(w1f), pad2(w2f), pad2(w3)]).astype(jnp.float32)
    pvec = jnp.stack([pad1(b1), pad1(b2), pad1(sn), pad1(bn)],
                     axis=1).astype(jnp.float32)                 # (rmax, 4)
    return wstack, pvec, (cin_p, c1, c2, cout)


# ----------------------------------------------------------------------------
# Forward pass (single (dims, radius, k) scale -> final cat is identity)
# ----------------------------------------------------------------------------
def sablock_forward(src_x, src_xyz, xyz, params, radius, k, *, tm=1024):
    wstack, pvec, dims = params
    cin_p, _, _, _ = dims
    feats, _ = route_cf(src_x, src_xyz, xyz, radius, k, cin_p)   # (B,K,CIN_P,M)
    b, _, _, m = feats.shape
    tm_eff = min(tm, _round_up(m, 128))
    m_pad = _round_up(m, tm_eff)
    if m_pad != m:
        feats = jnp.pad(feats, ((0, 0), (0, 0), (0, 0), (0, m_pad - m)))
    out = sablock_pallas(feats, wstack, pvec, dims, tm=tm_eff)   # (B, COUT, M_pad)
    # Output is already in the PyTorch (B, C_out, M) layout; only trim M padding.
    return out[:, :, :m] if m_pad != m else out


# ----------------------------------------------------------------------------
# Pure-JAX f32 reference emulating the PyTorch module (BN in eval mode)
# ----------------------------------------------------------------------------
def module_reference(src_x, src_xyz, xyz, w1, bn1, w2, bn2, w3, bnn,
                     radius, k, eps=1e-5):
    hi = jax.lax.Precision.HIGHEST
    idx = ball_query(src_xyz, xyz, radius, k)                    # (B, M, K)
    nx = gather_cf(src_x, idx)                                   # (B, K, C, M)
    nxyz = gather_cf(src_xyz, idx) - xyz[:, None, :, :]          # (B, K, 3, M)
    h = jnp.concatenate([nx, nxyz], axis=2)                      # (B, K, CIN, M)

    def conv_bn_relu(h, w, bnp):
        g, b, m, v = bnp
        h = jnp.einsum('oc,bkcm->bkom', w, h, precision=hi)
        h = (h - m[:, None]) * (g[:, None] / jnp.sqrt(v[:, None] + eps)) + b[:, None]
        return jnp.maximum(h, 0.0)

    h = conv_bn_relu(h, w1, bn1)
    h = conv_bn_relu(h, w2, bn2)
    h = jnp.einsum('oc,bkcm->bkom', w3, h, precision=hi)
    h = h.max(axis=1)                                            # (B, COUT, M)
    g, b, m, v = bnn
    h = (h - m[None, :, None]) * (g[None, :, None]
                                  / jnp.sqrt(v[None, :, None] + eps)) + b[None, :, None]
    return jnp.maximum(h, 0.0)


# ----------------------------------------------------------------------------
# Deterministic example inputs + test
# ----------------------------------------------------------------------------
if __name__ == "__main__":
    B, C_IN, N_SRC, M_QRY = 2, 4, 64, 16
    K = 8
    RADIUS = 0.8
    DIMS = (32, 32, 64)            # SABlock dims: in_dim+3 -> 32 -> 32 -> 64
    CIN = C_IN + 3

    key = jax.random.PRNGKey(0)
    ks = jax.random.split(key, 18)

    src_x = jax.random.normal(ks[0], (B, C_IN, N_SRC), jnp.float32)
    src_xyz = jax.random.uniform(ks[1], (B, 3, N_SRC), jnp.float32)
    xyz = jax.random.uniform(ks[2], (B, 3, M_QRY), jnp.float32)

    # Conv2d(1x1, bias=False) weights in PyTorch orientation (C_out, C_in).
    w1 = jax.random.normal(ks[3], (DIMS[0], CIN), jnp.float32) * 0.2
    w2 = jax.random.normal(ks[4], (DIMS[1], DIMS[0]), jnp.float32) * 0.2
    w3 = jax.random.normal(ks[5], (DIMS[2], DIMS[1]), jnp.float32) * 0.2

    def make_bn(i, c):
        g = 1.0 + 0.1 * jax.random.normal(ks[6 + 4 * i], (c,), jnp.float32)
        b = 0.1 * jax.random.normal(ks[7 + 4 * i], (c,), jnp.float32)
        m = 0.05 * jax.random.normal(ks[8 + 4 * i], (c,), jnp.float32)
        v = 1.0 + 0.2 * jax.random.uniform(ks[9 + 4 * i], (c,), jnp.float32)
        return (g, b, m, v)

    bn1 = make_bn(0, DIMS[0])
    bn2 = make_bn(1, DIMS[1])
    bnn = make_bn(2, DIMS[2])

    params = prepare_params(w1, bn1, w2, bn2, w3, bnn, cin=CIN)

    out = sablock_forward(src_x, src_xyz, xyz, params, RADIUS, K, tm=1024)
    out = jax.block_until_ready(out)
    assert out.shape == (B, DIMS[-1], M_QRY), out.shape

    ref = module_reference(src_x, src_xyz, xyz, w1, bn1, w2, bn2, w3, bnn,
                           RADIUS, K)
    ref = jax.block_until_ready(ref)
    assert ref.shape == out.shape
    err = float(jnp.max(jnp.abs(out - ref)))
    assert jnp.allclose(out, ref, atol=2e-2, rtol=2e-2), err

    print("KERNEL_OK")
</pallas_src>

<mosaic_0001>
module attributes {stable_mosaic.version = 11 : i64} {
  func.func @_sablock_kernel(%arg0: i32, %arg1: i32, %arg2: memref<1x8x8x128xf32, #tpu.memory_space<vmem>>, %arg3: memref<3x64x32xf32, #tpu.memory_space<vmem>>, %arg4: memref<64x4xf32, #tpu.memory_space<vmem>>, %arg5: memref<1x64x128xf32, #tpu.memory_space<vmem>>) attributes {dimension_semantics = [#tpu.dimension_semantics<parallel>, #tpu.dimension_semantics<parallel>], iteration_bounds = array<i64: 2, 1>, scalar_prefetch = 0 : i64, scratch_operands = 0 : i64, tpu.core_type = #tpu.core_type<tc>, window_params = [{transform_indices = @transform_0, window_bounds = array<i64: 1, 8, 8, 128>}, {pipeline_mode = #tpu.pipeline_mode<synchronous>, transform_indices = @transform_1, window_bounds = array<i64: 3, 64, 32>}, {pipeline_mode = #tpu.pipeline_mode<synchronous>, transform_indices = @transform_2, window_bounds = array<i64: 64, 4>}, {transform_indices = @transform_3, window_bounds = array<i64: 1, 64, 128>}]} {
    %c0 = arith.constant 0 : index
    %c0_0 = arith.constant 0 : index
    %c0_1 = arith.constant 0 : index
    %0 = vector.load %arg3[%c0, %c0_0, %c0_1] : memref<3x64x32xf32, #tpu.memory_space<vmem>>, vector<3x64x32xf32>
    %c0_2 = arith.constant 0 : index
    %c0_3 = arith.constant 0 : index
    %1 = vector.load %arg4[%c0_2, %c0_3] : memref<64x4xf32, #tpu.memory_space<vmem>>, vector<64x4xf32>
    %2 = vector.extract_strided_slice %0 {offsets = [0, 0, 0], sizes = [1, 32, 8], strides = [1, 1, 1]} : vector<3x64x32xf32> to vector<1x32x8xf32>
    %3 = vector.shape_cast %2 : vector<1x32x8xf32> to vector<32x8xf32>
    %4 = vector.extract_strided_slice %0 {offsets = [1, 0, 0], sizes = [1, 32, 32], strides = [1, 1, 1]} : vector<3x64x32xf32> to vector<1x32x32xf32>
    %5 = vector.shape_cast %4 : vector<1x32x32xf32> to vector<32x32xf32>
    %6 = vector.extract_strided_slice %0 {offsets = [2, 0, 0], sizes = [1, 64, 32], strides = [1, 1, 1]} : vector<3x64x32xf32> to vector<1x64x32xf32>
    %7 = vector.shape_cast %6 : vector<1x64x32xf32> to vector<64x32xf32>
    %8 = vector.extract_strided_slice %1 {offsets = [0, 0], sizes = [32, 1], strides = [1, 1]} : vector<64x4xf32> to vector<32x1xf32>
    %9 = vector.extract_strided_slice %1 {offsets = [0, 1], sizes = [32, 1], strides = [1, 1]} : vector<64x4xf32> to vector<32x1xf32>
    %10 = vector.extract_strided_slice %1 {offsets = [0, 2], sizes = [64, 1], strides = [1, 1]} : vector<64x4xf32> to vector<64x1xf32>
    %11 = vector.extract_strided_slice %1 {offsets = [0, 3], sizes = [64, 1], strides = [1, 1]} : vector<64x4xf32> to vector<64x1xf32>
    %cst = arith.constant 0xFF800000 : f32
    %12 = vector.broadcast %cst : f32 to vector<64x128xf32>
    %c0_4 = arith.constant 0 : index
    %c0_5 = arith.constant 0 : index
    %c0_6 = arith.constant 0 : index
    %c0_7 = arith.constant 0 : index
    %13 = vector.load %arg2[%c0_4, %c0_5, %c0_6, %c0_7] : memref<1x8x8x128xf32, #tpu.memory_space<vmem>>, vector<1x1x8x128xf32>
    %14 = vector.shape_cast %13 : vector<1x1x8x128xf32> to vector<8x128xf32>
    %cst_8 = arith.constant dense<0.000000e+00> : vector<32x128xf32>
    %15 = tpu.matmul %3, %14, %cst_8 {dimension_numbers = #tpu.dot_dimension_numbers<[1], [0], [0], [1], [0, 0, 1, 1], [], []>} : vector<32x8xf32>, vector<8x128xf32>, vector<32x128xf32> -> vector<32x128xf32>
    %16 = vector.broadcast %8 : vector<32x1xf32> to vector<32x128xf32>
    %17 = arith.addf %15, %16 : vector<32x128xf32>
    %cst_9 = arith.constant 0.000000e+00 : f32
    %18 = vector.broadcast %cst_9 : f32 to vector<32x128xf32>
    %19 = arith.maximumf %17, %18 : vector<32x128xf32>
    %cst_10 = arith.constant dense<0.000000e+00> : vector<32x128xf32>
    %20 = tpu.matmul %5, %19, %cst_10 {dimension_numbers = #tpu.dot_dimension_numbers<[1], [0], [0], [1], [0, 0, 1, 1], [], []>} : vector<32x32xf32>, vector<32x128xf32>, vector<32x128xf32> -> vector<32x128xf32>
    %21 = vector.broadcast %9 : vector<32x1xf32> to vector<32x128xf32>
    %22 = arith.addf %20, %21 : vector<32x128xf32>
    %cst_11 = arith.constant 0.000000e+00 : f32
    %23 = vector.broadcast %cst_11 : f32 to vector<32x128xf32>
    %24 = arith.maximumf %22, %23 : vector<32x128xf32>
    %cst_12 = arith.constant dense<0.000000e+00> : vector<64x128xf32>
    %25 = tpu.matmul %7, %24, %cst_12 {dimension_numbers = #tpu.dot_dimension_numbers<[1], [0], [0], [1], [0, 0, 1, 1], [], []>} : vector<64x32xf32>, vector<32x128xf32>, vector<64x128xf32> -> vector<64x128xf32>
    %26 = arith.maximumf %12, %25 : vector<64x128xf32>
    %c0_13 = arith.constant 0 : index
    %c1 = arith.constant 1 : index
    %c0_14 = arith.constant 0 : index
    %c0_15 = arith.constant 0 : index
    %27 = vector.load %arg2[%c0_13, %c1, %c0_14, %c0_15] : memref<1x8x8x128xf32, #tpu.memory_space<vmem>>, vector<1x1x8x128xf32>
    %28 = vector.shape_cast %27 : vector<1x1x8x128xf32> to vector<8x128xf32>
    %cst_16 = arith.constant dense<0.000000e+00> : vector<32x128xf32>
    %29 = tpu.matmul %3, %28, %cst_16 {dimension_numbers = #tpu.dot_dimension_numbers<[1], [0], [0], [1], [0, 0, 1, 1], [], []>} : vector<32x8xf32>, vector<8x128xf32>, vector<32x128xf32> -> vector<32x128xf32>
    %30 = vector.broadcast %8 : vector<32x1xf32> to vector<32x128xf32>
    %31 = arith.addf %29, %30 : vector<32x128xf32>
    %cst_17 = arith.constant 0.000000e+00 : f32
    %32 = vector.broadcast %cst_17 : f32 to vector<32x128xf32>
    %33 = arith.maximumf %31, %32 : vector<32x128xf32>
    %cst_18 = arith.constant dense<0.000000e+00> : vector<32x128xf32>
    %34 = tpu.matmul %5, %33, %cst_18 {dimension_numbers = #tpu.dot_dimension_numbers<[1], [0], [0], [1], [0, 0, 1, 1], [], []>} : vector<32x32xf32>, vector<32x128xf32>, vector<32x128xf32> -> vector<32x128xf32>
    %35 = vector.broadcast %9 : vector<32x1xf32> to vector<32x128xf32>
    %36 = arith.addf %34, %35 : vector<32x128xf32>
    %cst_19 = arith.constant 0.000000e+00 : f32
    %37 = vector.broadcast %cst_19 : f32 to vector<32x128xf32>
    %38 = arith.maximumf %36, %37 : vector<32x128xf32>
    %cst_20 = arith.constant dense<0.000000e+00> : vector<64x128xf32>
    %39 = tpu.matmul %7, %38, %cst_20 {dimension_numbers = #tpu.dot_dimension_numbers<[1], [0], [0], [1], [0, 0, 1, 1], [], []>} : vector<64x32xf32>, vector<32x128xf32>, vector<64x128xf32> -> vector<64x128xf32>
    %40 = arith.maximumf %26, %39 : vector<64x128xf32>
    %c0_21 = arith.constant 0 : index
    %c2 = arith.constant 2 : index
    %c0_22 = arith.constant 0 : index
    %c0_23 = arith.constant 0 : index
    %41 = vector.load %arg2[%c0_21, %c2, %c0_22, %c0_23] : memref<1x8x8x128xf32, #tpu.memory_space<vmem>>, vector<1x1x8x128xf32>
    %42 = vector.shape_cast %41 : vector<1x1x8x128xf32> to vector<8x128xf32>
    %cst_24 = arith.constant dense<0.000000e+00> : vector<32x128xf32>
    %43 = tpu.matmul %3, %42, %cst_24 {dimension_numbers = #tpu.dot_dimension_numbers<[1], [0], [0], [1], [0, 0, 1, 1], [], []>} : vector<32x8xf32>, vector<8x128xf32>, vector<32x128xf32> -> vector<32x128xf32>
    %44 = vector.broadcast %8 : vector<32x1xf32> to vector<32x128xf32>
    %45 = arith.addf %43, %44 : vector<32x128xf32>
    %cst_25 = arith.constant 0.000000e+00 : f32
    %46 = vector.broadcast %cst_25 : f32 to vector<32x128xf32>
    %47 = arith.maximumf %45, %46 : vector<32x128xf32>
    %cst_26 = arith.constant dense<0.000000e+00> : vector<32x128xf32>
    %48 = tpu.matmul %5, %47, %cst_26 {dimension_numbers = #tpu.dot_dimension_numbers<[1], [0], [0], [1], [0, 0, 1, 1], [], []>} : vector<32x32xf32>, vector<32x128xf32>, vector<32x128xf32> -> vector<32x128xf32>
    %49 = vector.broadcast %9 : vector<32x1xf32> to vector<32x128xf32>
    %50 = arith.addf %48, %49 : vector<32x128xf32>
    %cst_27 = arith.constant 0.000000e+00 : f32
    %51 = vector.broadcast %cst_27 : f32 to vector<32x128xf32>
    %52 = arith.maximumf %50, %51 : vector<32x128xf32>
    %cst_28 = arith.constant dense<0.000000e+00> : vector<64x128xf32>
    %53 = tpu.matmul %7, %52, %cst_28 {dimension_numbers = #tpu.dot_dimension_numbers<[1], [0], [0], [1], [0, 0, 1, 1], [], []>} : vector<64x32xf32>, vector<32x128xf32>, vector<64x128xf32> -> vector<64x128xf32>
    %54 = arith.maximumf %40, %53 : vector<64x128xf32>
    %c0_29 = arith.constant 0 : index
    %c3 = arith.constant 3 : index
    %c0_30 = arith.constant 0 : index
    %c0_31 = arith.constant 0 : index
    %55 = vector.load %arg2[%c0_29, %c3, %c0_30, %c0_31] : memref<1x8x8x128xf32, #tpu.memory_space<vmem>>, vector<1x1x8x128xf32>
    %56 = vector.shape_cast %55 : vector<1x1x8x128xf32> to vector<8x128xf32>
    %cst_32 = arith.constant dense<0.000000e+00> : vector<32x128xf32>
    %57 = tpu.matmul %3, %56, %cst_32 {dimension_numbers = #tpu.dot_dimension_numbers<[1], [0], [0], [1], [0, 0, 1, 1], [], []>} : vector<32x8xf32>, vector<8x128xf32>, vector<32x128xf32> -> vector<32x128xf32>
    %58 = vector.broadcast %8 : vector<32x1xf32> to vector<32x128xf32>
    %59 = arith.addf %57, %58 : vector<32x128xf32>
    %cst_33 = arith.constant 0.000000e+00 : f32
    %60 = vector.broadcast %cst_33 : f32 to vector<32x128xf32>
    %61 = arith.maximumf %59, %60 : vector<32x128xf32>
    %cst_34 = arith.constant dense<0.000000e+00> : vector<32x128xf32>
    %62 = tpu.matmul %5, %61, %cst_34 {dimension_numbers = #tpu.dot_dimension_numbers<[1], [0], [0], [1], [0, 0, 1, 1], [], []>} : vector<32x32xf32>, vector<32x128xf32>, vector<32x128xf32> -> vector<32x128xf32>
    %63 = vector.broadcast %9 : vector<32x1xf32> to vector<32x128xf32>
    %64 = arith.addf %62, %63 : vector<32x128xf32>
    %cst_35 = arith.constant 0.000000e+00 : f32
    %65 = vector.broadcast %cst_35 : f32 to vector<32x128xf32>
    %66 = arith.maximumf %64, %65 : vector<32x128xf32>
    %cst_36 = arith.constant dense<0.000000e+00> : vector<64x128xf32>
    %67 = tpu.matmul %7, %66, %cst_36 {dimension_numbers = #tpu.dot_dimension_numbers<[1], [0], [0], [1], [0, 0, 1, 1], [], []>} : vector<64x32xf32>, vector<32x128xf32>, vector<64x128xf32> -> vector<64x128xf32>
    %68 = arith.maximumf %54, %67 : vector<64x128xf32>
    %c0_37 = arith.constant 0 : index
    %c4 = arith.constant 4 : index
    %c0_38 = arith.constant 0 : index
    %c0_39 = arith.constant 0 : index
    %69 = vector.load %arg2[%c0_37, %c4, %c0_38, %c0_39] : memref<1x8x8x128xf32, #tpu.memory_space<vmem>>, vector<1x1x8x128xf32>
    %70 = vector.shape_cast %69 : vector<1x1x8x128xf32> to vector<8x128xf32>
    %cst_40 = arith.constant dense<0.000000e+00> : vector<32x128xf32>
    %71 = tpu.matmul %3, %70, %cst_40 {dimension_numbers = #tpu.dot_dimension_numbers<[1], [0], [0], [1], [0, 0, 1, 1], [], []>} : vector<32x8xf32>, vector<8x128xf32>, vector<32x128xf32> -> vector<32x128xf32>
    %72 = vector.broadcast %8 : vector<32x1xf32> to vector<32x128xf32>
    %73 = arith.addf %71, %72 : vector<32x128xf32>
    %cst_41 = arith.constant 0.000000e+00 : f32
    %74 = vector.broadcast %cst_41 : f32 to vector<32x128xf32>
    %75 = arith.maximumf %73, %74 : vector<32x128xf32>
    %cst_42 = arith.constant dense<0.000000e+00> : vector<32x128xf32>
    %76 = tpu.matmul %5, %75, %cst_42 {dimension_numbers = #tpu.dot_dimension_numbers<[1], [0], [0], [1], [0, 0, 1, 1], [], []>} : vector<32x32xf32>, vector<32x128xf32>, vector<32x128xf32> -> vector<32x128xf32>
    %77 = vector.broadcast %9 : vector<32x1xf32> to vector<32x128xf32>
    %78 = arith.addf %76, %77 : vector<32x128xf32>
    %cst_43 = arith.constant 0.000000e+00 : f32
    %79 = vector.broadcast %cst_43 : f32 to vector<32x128xf32>
    %80 = arith.maximumf %78, %79 : vector<32x128xf32>
    %cst_44 = arith.constant dense<0.000000e+00> : vector<64x128xf32>
    %81 = tpu.matmul %7, %80, %cst_44 {dimension_numbers = #tpu.dot_dimension_numbers<[1], [0], [0], [1], [0, 0, 1, 1], [], []>} : vector<64x32xf32>, vector<32x128xf32>, vector<64x128xf32> -> vector<64x128xf32>
    %82 = arith.maximumf %68, %81 : vector<64x128xf32>
    %c0_45 = arith.constant 0 : index
    %c5 = arith.constant 5 : index
    %c0_46 = arith.constant 0 : index
    %c0_47 = arith.constant 0 : index
    %83 = vector.load %arg2[%c0_45, %c5, %c0_46, %c0_47] : memref<1x8x8x128xf32, #tpu.memory_space<vmem>>, vector<1x1x8x128xf32>
    %84 = vector.shape_cast %83 : vector<1x1x8x128xf32> to vector<8x128xf32>
    %cst_48 = arith.constant dense<0.000000e+00> : vector<32x128xf32>
    %85 = tpu.matmul %3, %84, %cst_48 {dimension_numbers = #tpu.dot_dimension_numbers<[1], [0], [0], [1], [0, 0, 1, 1], [], []>} : vector<32x8xf32>, vector<8x128xf32>, vector<32x128xf32> -> vector<32x128xf32>
    %86 = vector.broadcast %8 : vector<32x1xf32> to vector<32x128xf32>
    %87 = arith.addf %85, %86 : vector<32x128xf32>
    %cst_49 = arith.constant 0.000000e+00 : f32
    %88 = vector.broadcast %cst_49 : f32 to vector<32x128xf32>
    %89 = arith.maximumf %87, %88 : vector<32x128xf32>
    %cst_50 = arith.constant dense<0.000000e+00> : vector<32x128xf32>
    %90 = tpu.matmul %5, %89, %cst_50 {dimension_numbers = #tpu.dot_dimension_numbers<[1], [0], [0], [1], [0, 0, 1, 1], [], []>} : vector<32x32xf32>, vector<32x128xf32>, vector<32x128xf32> -> vector<32x128xf32>
    %91 = vector.broadcast %9 : vector<32x1xf32> to vector<32x128xf32>
    %92 = arith.addf %90, %91 : vector<32x128xf32>
    %cst_51 = arith.constant 0.000000e+00 : f32
    %93 = vector.broadcast %cst_51 : f32 to vector<32x128xf32>
    %94 = arith.maximumf %92, %93 : vector<32x128xf32>
    %cst_52 = arith.constant dense<0.000000e+00> : vector<64x128xf32>
    %95 = tpu.matmul %7, %94, %cst_52 {dimension_numbers = #tpu.dot_dimension_numbers<[1], [0], [0], [1], [0, 0, 1, 1], [], []>} : vector<64x32xf32>, vector<32x128xf32>, vector<64x128xf32> -> vector<64x128xf32>
    %96 = arith.maximumf %82, %95 : vector<64x128xf32>
    %c0_53 = arith.constant 0 : index
    %c6 = arith.constant 6 : index
    %c0_54 = arith.constant 0 : index
    %c0_55 = arith.constant 0 : index
    %97 = vector.load %arg2[%c0_53, %c6, %c0_54, %c0_55] : memref<1x8x8x128xf32, #tpu.memory_space<vmem>>, vector<1x1x8x128xf32>
    %98 = vector.shape_cast %97 : vector<1x1x8x128xf32> to vector<8x128xf32>
    %cst_56 = arith.constant dense<0.000000e+00> : vector<32x128xf32>
    %99 = tpu.matmul %3, %98, %cst_56 {dimension_numbers = #tpu.dot_dimension_numbers<[1], [0], [0], [1], [0, 0, 1, 1], [], []>} : vector<32x8xf32>, vector<8x128xf32>, vector<32x128xf32> -> vector<32x128xf32>
    %100 = vector.broadcast %8 : vector<32x1xf32> to vector<32x128xf32>
    %101 = arith.addf %99, %100 : vector<32x128xf32>
    %cst_57 = arith.constant 0.000000e+00 : f32
    %102 = vector.broadcast %cst_57 : f32 to vector<32x128xf32>
    %103 = arith.maximumf %101, %102 : vector<32x128xf32>
    %cst_58 = arith.constant dense<0.000000e+00> : vector<32x128xf32>
    %104 = tpu.matmul %5, %103, %cst_58 {dimension_numbers = #tpu.dot_dimension_numbers<[1], [0], [0], [1], [0, 0, 1, 1], [], []>} : vector<32x32xf32>, vector<32x128xf32>, vector<32x128xf32> -> vector<32x128xf32>
    %105 = vector.broadcast %9 : vector<32x1xf32> to vector<32x128xf32>
    %106 = arith.addf %104, %105 : vector<32x128xf32>
    %cst_59 = arith.constant 0.000000e+00 : f32
    %107 = vector.broadcast %cst_59 : f32 to vector<32x128xf32>
    %108 = arith.maximumf %106, %107 : vector<32x128xf32>
    %cst_60 = arith.constant dense<0.000000e+00> : vector<64x128xf32>
    %109 = tpu.matmul %7, %108, %cst_60 {dimension_numbers = #tpu.dot_dimension_numbers<[1], [0], [0], [1], [0, 0, 1, 1], [], []>} : vector<64x32xf32>, vector<32x128xf32>, vector<64x128xf32> -> vector<64x128xf32>
    %110 = arith.maximumf %96, %109 : vector<64x128xf32>
    %c0_61 = arith.constant 0 : index
    %c7 = arith.constant 7 : index
    %c0_62 = arith.constant 0 : index
    %c0_63 = arith.constant 0 : index
    %111 = vector.load %arg2[%c0_61, %c7, %c0_62, %c0_63] : memref<1x8x8x128xf32, #tpu.memory_space<vmem>>, vector<1x1x8x128xf32>
    %112 = vector.shape_cast %111 : vector<1x1x8x128xf32> to vector<8x128xf32>
    %cst_64 = arith.constant dense<0.000000e+00> : vector<32x128xf32>
    %113 = tpu.matmul %3, %112, %cst_64 {dimension_numbers = #tpu.dot_dimension_numbers<[1], [0], [0], [1], [0, 0, 1, 1], [], []>} : vector<32x8xf32>, vector<8x128xf32>, vector<32x128xf32> -> vector<32x128xf32>
    %114 = vector.broadcast %8 : vector<32x1xf32> to vector<32x128xf32>
    %115 = arith.addf %113, %114 : vector<32x128xf32>
    %cst_65 = arith.constant 0.000000e+00 : f32
    %116 = vector.broadcast %cst_65 : f32 to vector<32x128xf32>
    %117 = arith.maximumf %115, %116 : vector<32x128xf32>
    %cst_66 = arith.constant dense<0.000000e+00> : vector<32x128xf32>
    %118 = tpu.matmul %5, %117, %cst_66 {dimension_numbers = #tpu.dot_dimension_numbers<[1], [0], [0], [1], [0, 0, 1, 1], [], []>} : vector<32x32xf32>, vector<32x128xf32>, vector<32x128xf32> -> vector<32x128xf32>
    %119 = vector.broadcast %9 : vector<32x1xf32> to vector<32x128xf32>
    %120 = arith.addf %118, %119 : vector<32x128xf32>
    %cst_67 = arith.constant 0.000000e+00 : f32
    %121 = vector.broadcast %cst_67 : f32 to vector<32x128xf32>
    %122 = arith.maximumf %120, %121 : vector<32x128xf32>
    %cst_68 = arith.constant dense<0.000000e+00> : vector<64x128xf32>
    %123 = tpu.matmul %7, %122, %cst_68 {dimension_numbers = #tpu.dot_dimension_numbers<[1], [0], [0], [1], [0, 0, 1, 1], [], []>} : vector<64x32xf32>, vector<32x128xf32>, vector<64x128xf32> -> vector<64x128xf32>
    %124 = arith.maximumf %110, %123 : vector<64x128xf32>
    %125 = vector.broadcast %10 : vector<64x1xf32> to vector<64x128xf32>
    %126 = arith.mulf %124, %125 : vector<64x128xf32>
    %127 = vector.broadcast %11 : vector<64x1xf32> to vector<64x128xf32>
    %128 = arith.addf %126, %127 : vector<64x128xf32>
    %cst_69 = arith.constant 0.000000e+00 : f32
    %129 = vector.broadcast %cst_69 : f32 to vector<64x128xf32>
    %130 = arith.maximumf %128, %129 : vector<64x128xf32>
    %c0_70 = arith.constant 0 : index
    %c0_71 = arith.constant 0 : index
    %c0_72 = arith.constant 0 : index
    %131 = vector.load %arg5[%c0_70, %c0_71, %c0_72] : memref<1x64x128xf32, #tpu.memory_space<vmem>>, vector<1x64x128xf32>
    %132 = vector.shape_cast %131 : vector<1x64x128xf32> to vector<64x128xf32>
    %133 = vector.shape_cast %130 : vector<64x128xf32> to vector<1x64x128xf32>
    tpu.vector_store %arg5[%c0_70, %c0_71, %c0_72], %133 {strides = array<i32>} : memref<1x64x128xf32, #tpu.memory_space<vmem>>, vector<1x64x128xf32>,
    return
  }
  func.func @transform_0(%arg0: i32, %arg1: i32) -> (i32, i32, i32, i32) {
    %c0_i32 = arith.constant 0 : i32
    %c0_i32_0 = arith.constant 0 : i32
    %c0_i32_1 = arith.constant 0 : i32
    return %arg0, %c0_i32, %c0_i32_0, %arg1 : i32, i32, i32, i32
  }
  func.func @transform_1(%arg0: i32, %arg1: i32) -> (i32, i32, i32) {
    %c0_i32 = arith.constant 0 : i32
    %c0_i32_0 = arith.constant 0 : i32
    %c0_i32_1 = arith.constant 0 : i32
    %c0_i32_2 = arith.constant 0 : i32
    return %c0_i32, %c0_i32_0, %c0_i32_1 : i32, i32, i32
  }
  func.func @transform_2(%arg0: i32, %arg1: i32) -> (i32, i32) {
    %c0_i32 = arith.constant 0 : i32
    %c0_i32_0 = arith.constant 0 : i32
    %c0_i32_1 = arith.constant 0 : i32
    return %c0_i32, %c0_i32_0 : i32, i32
  }
  func.func @transform_3(%arg0: i32, %arg1: i32) -> (i32, i32, i32) {
    %c0_i32 = arith.constant 0 : i32
    %c0_i32_0 = arith.constant 0 : i32
    return %arg0, %c0_i32, %arg1 : i32, i32, i32
  }
}

</mosaic_0001>

<bundles_post_ra>
// kernel: tpu_custom_call.1
= control target key start
LH: loop header
LB: loop body
LE: loop exit
PB: predicated region body
PF: predicated region fallthrough
CT: control target
= control target key end

     0   :  { %8 = vsyncpa [#allocation3], 0  ;;  %s4662_s0 = inlined_call_operand.vmem [shape: f32[2,8,8,128], index: 0, kind: input, shape index: {}]   ;;  %s4663_s1 = inlined_call_operand.vmem [shape: f32[3,64,32], index: 1, kind: input, shape index: {}]   ;;  %s4664_s2 = inlined_call_operand.vmem [shape: f32[64,4], index: 2, kind: input, shape index: {}]   ;;  %s4665_s3 = inlined_call_operand.hbm [shape: f32[2,64,128], index: 3, kind: output, shape index: {}]  }
   0x1   :  { %10 = vsyncpa [#allocation3 + $0x1], 0  ;;  %s3832_s12 = smov 0   ;;  %s3834_s13 = smov 0  }
   0x2   :  { %s3836_s14 = smov 0   ;;  %s3838_s15 = smov 0  }
   0x3   :  { %s3840_s16 = smov 0   ;;  %s3842_s17 = smov 0  }
   0x4 LB: > { %s2832_s18 = sadd.s32 4294967295, %s3803_s17   ;;  %s2833_s19 = sadd.s32 4294967294, %s3803_s17   ;;  %s3803_s17 = sphi %s3842_s17, %s16_s17   ;;  %s3799_s16 = sphi %s3840_s16, %s4674_s16   ;;  %s3795_s15 = sphi %s3838_s15, %s4673_s15   ;;  %s3791_s14 = sphi %s3836_s14, %s4672_s14   ;;  %s3787_s13 = sphi %s3834_s13, %s4671_s13   ;;  %s3783_s12 = sphi %s3832_s12, %s4670_s12  }
   0x5   : > { %s28_s20 = sadd.s32 1, %s3799_s16  ;;  %s107_s21 = sadd.s32 1, %s3791_s14 }
   0x6   : > { %p30_p0 = scmp.ge.s32.totalorder %s28_s20, 2  ;;  %p117_p1 = scmp.ne.s32.totalorder %s3791_s14, %s3787_s13 }
   0x7   : > { %p118_p2 = scmp.eq.s32.totalorder %s2832_s18, 1  ;;  %p123_p3 = scmp.ne.s32.totalorder %s3787_s13, %s3783_s12 }
   0x8   : > { %s4676_s20 = smov (%p30_p0, %s28_s20), 0  ;;  %p124_p5 = scmp.eq.s32.totalorder %s2833_s19, 1 }
   0x9   : > { %p3872_p4 = por %p118_p2, %p117_p1  ;;  %s102_s23 = ssub.s32 %s3799_s16, %s4676_s20 }
   0xa   : > { %p2836_p6 = scmp.ge.s32.totalorder %s3803_s17, 1  ;;  %p105_p7 = scmp.eq.s32.totalorder %s102_s23, 0 }
   0xb   : > { %p3879_p8 = por %p124_p5, %p123_p3  ;;  %p159_p9 = scmp.lt.s32.totalorder %s3803_s17, 3 }
   0xc   : > { %s3885_s25 = scalar_select %p105_p7, %s3791_s14, %s107_s21  }
   0xd   : > { %p160_p10 = pnand %p2836_p6, %p159_p9 }
   0xe   : > { %p186_p11 = scmp.lt.s32.totalorder (!%p160_p10), %s3795_s15, 1  ;;  %v3891_v0 = vld [vmem:[%s4663_s1] sm:$0xff] (!%p160_p10)  ;;  %vm239_vm0 = vcmask (!%p160_p10), 64512   ;;  %v3805_v1 = vmov (!%p160_p10), 0   ;;  %v212_v3 = vld [vmem:[%s4664_s2 + $0x10] sm:$0xff] (!%p160_p10)  ;;  %v211_v4 = vld [vmem:[%s4664_s2 + $0x8] sm:$0xff] (!%p160_p10) }
   0xf   : > { %163 = sbr.rel (%p160_p10) target bundleno = 2599 (0xa27), region = 32  ;;  %3184 = vmatprep.mubr.msk.f32.mxu0 (!%p160_p10), %vm239_vm0, %v3891_v0  ;;  %3711 = vset.pattern.permute.xlu0 (!%p160_p10), %v3805_v1  ;;  %v210_v2 = vld [vmem:[%s4664_s2] sm:$0xff] (!%p160_p10)  ;;  %v213_v5 = vld [vmem:[%s4664_s2 + $0x18] sm:$0xff] (!%p160_p10)  ;;  %v3917_v7 = vld [vmem:[%s4663_s1 + $0x8] sm:$0xff] (!%p160_p10)  ;;  %vm357_vm1 = vcmask (!%p160_p10), 261120   ;;  %v3806_v11 = vmov (!%p160_p10), 1  }
  0x10   : > { %221 = vperm.xlu0 (!%p160_p10), %3711, %v210_v2   ;;  %3712 = vset.pattern.permute.xlu1 (!%p160_p10), %v3805_v1  ;;  %v3922_v8 = vld [vmem:[%s4663_s1 + $0x10] sm:$0xff] (!%p160_p10)  ;;  %v3931_v9 = vld [vmem:[%s4663_s1 + $0x18] sm:$0xff] (!%p160_p10)  ;;  %v3938_v10 = vld [vmem:[%s4663_s1 + $0x40] sm:$0xff] (!%p160_p10)  ;;  %s183_s21 = sand.u32 (!%p160_p10), 1, %s3787_s13   ;;  %s2981_s27 = sshll.u32 (!%p160_p10), %s3795_s15, 10 }
  0x11   : > { %231 = vperm.xlu1 (!%p160_p10), %3712, %v212_v3   ;;  %3198 = vmatprep.mubr.msk.f32.mxu1 (!%p160_p10), %vm357_vm1, %v3938_v10  ;;  %v3957_v30 = vld [vmem:[%s4663_s1 + $0x48] sm:$0xff] (!%p160_p10)  ;;  %v3962_v31 = vld [vmem:[%s4663_s1 + $0x50] sm:$0xff] (!%p160_p10)  ;;  %v3971_v32 = vld [vmem:[%s4663_s1 + $0x58] sm:$0xff] (!%p160_p10)  ;;  %s2837_s23 = sshll.u32 (!%p160_p10), %s183_s21, 6  ;;  %s4608_s4 = scalar_lea.hbm (!%p160_p10), %s4665_s3, %s2981_s27 }
  0x12   : > { %v3978_v33 = vld [vmem:[%s4663_s1 + $0xb0] sm:$0xff] (!%p160_p10)  ;;  %v3998_v53 = vld [vmem:[%s4663_s1 + $0xb8] sm:$0xff] (!%p160_p10)  ;;  %s4591_s26 = scalar_lea.vmem (!%p160_p10), [#allocation2], %s2837_s23  ;;  %s3809_s6 = smov (!%p160_p10), [#allocation2]  }
  0x13   : > { %s2754_s28 = sshll.u32 (!%p160_p10), %s4591_s26, 4  ;;  %s3729_s7 = sshll.u32 (!%p160_p10), %s3809_s6, 4  ;;  %s4610_s28 = int_to_ptr.vmem [resolvable:$true] %s2754_s28  ;;  %s3730_s7 = int_to_ptr.vmem [resolvable:$false] %s3729_s7 }
  0x14   : > { %226 = vperm.xlu0 (!%p160_p10), %3711, %v211_v4   ;;  %p3732_p1 = scmp.lt.s32.totalorder (!%p160_p10), %s4610_s28, %s3730_s7 }
  0x15   : > { %236 = vperm.xlu1 (!%p160_p10), %3712, %v213_v5  }
  0x16   : > { %s187_s5 = scalar_select %p186_p11, %s3795_s15, 1 }
  0x17   : > { %s4616_s15 = scalar_lea.sflag [#allocation3], %s183_s21 }
  0x18   : > { %s2980_s8 = sshll.u32 %s187_s5, 6  ;;  %3713 = vset.pattern.permute.xlu0 %v3806_v11  ;;  %s3725_s5 = scalar_lea.vmem %s4610_s28, 1024 }
  0x19   : > { %s3911_s19 = scalar_lea.vmem %s4662_s0, %s2980_s8  ;;  %3714 = vset.pattern.permute.xlu1 %v3806_v11  ;;  %342 = vperm.xlu0 %3713, %v210_v2   ;;  %p3726_p12 = scmp.ne.s32.totalorder %s4610_s28, %s3725_s5 }
  0x1a   : > { %v218_v6 = vld [vmem:[%s3911_s19] sm:$0xff]  ;;  %346 = vperm.xlu1 %3714, %v211_v4   ;;  %v2856_v52 = vld [vmem:[%s3911_s19 + $0x8] sm:$0xff]  ;;  %v2873_v11 = vld [vmem:[%s3911_s19 + $0x10] sm:$0xff]  ;;  %s3731_s8 = scalar_lea.vmem %s3730_s7, 2048 }
  0x1b   : > { %3182 = vmatprep.subr.mxu0 %v218_v6  ;;  %p3727_p13 = pnand %p3726_p12, %p3872_p4  ;;  %p3733_p2 = scmp.lt.s32.totalorder %s3731_s8, %s3725_s5 }
  0x1c   : > { %3183 = vmatpush3.msra.mxu0 %v218_v6 }
  0x1d   : > { %3185 = vmatmul.mubr.msk.f32.vlgmr.msra.gmra.mrb[0].mxu0 %vm239_vm0, %v3917_v7  ;;  %354 = vperm.xlu0 %3713, %v213_v5   ;;  %p3728_p0 = pneg %p3727_p13  ;;  %p3734_p3 = por %p3733_p2, %p3732_p1 }
  0x1e   : > { %3187 = vmatprep.mubr.msk.f32.mxu0 %vm239_vm0, %v3922_v8  ;;  %350 = vperm.xlu1 %3714, %v212_v3  }
  0x1f   : > { %p3735_p5 = pnand %p3734_p3, %p3728_p0 }
  0x21   : > { %3188 = vmatmul.mubr.msk.f32.gmra.mrb[2].mxu0 %vm239_vm0, %v3931_v9 }
  0x8f   : > { %v3942_v12 = vpop.permute.xlu0 %221 }
  0x90   : > { %v3944_v13 = vpop.permute.xlu1 %231 }
  0x93   : > { %v3946_v14 = vpop.permute.xlu0 %226 }
  0x94   : > { %v3950_v20 = vpop.permute.xlu1 %236 }
  0x98   : > { %v3982_v34 = vpop.permute.xlu0 %342 }
  0x99   : > { %v3984_v35 = vpop.permute.xlu1 %346 }
  0x9c   : > { %v3988_v41 = vpop.permute.xlu0 %354 }
  0x9d   : > { %v3990_v44 = vpop.permute.xlu1 %350 }
  0xf0   : > { %v3186_v15 = vpop.f32.mrb[0].mxu0 }
  0xf1   : > { %v324_v16 = vadd.f32 %v3186_v15, %v3946_v14  ;;  %v318_v17 = vpop.f32.mrb[1].mxu0  ;;  %v4040_v15 = vld [vmem:[%s4663_s1 + $0x80] sm:$0xff] }
  0xf2   : > { %v319_v18 = vadd.f32 %v318_v17, %v3942_v12  ;;  %3212 = vmatprep.mubr.msk.f32.mxu0 %vm357_vm1, %v4040_v15  ;;  %v4054_v17 = vld [vmem:[%s4663_s1 + $0x90] sm:$0xff] }
  0xf3   : > { %v338_v19 = vmax.f32 %v324_v16, 0.0  ;;  %v4047_v16 = vld [vmem:[%s4663_s1 + $0x88] sm:$0xff] }
  0xf4   : > { %v337_v21 = vmax.f32 %v319_v18, 0.0  ;;  %v3189_v22 = vpop.f32.mrb[2].mxu0  ;;  %v4061_v18 = vld [vmem:[%s4663_s1 + $0x98] sm:$0xff] }
  0xf5   : > { %v334_v23 = vadd.f32 %v3189_v22, %v3950_v20  ;;  %v328_v24 = vpop.f32.mrb[3].mxu0 }
  0xf6   : > { %v329_v25 = vadd.f32 %v328_v24, %v3944_v13  ;;  %v3518_v26 = vpack.c.bf16 %v338_v19, %v337_v21  ;;  %v4068_v19 = vld [vmem:[%s4663_s1 + $0xa0] sm:$0xff]  ;;  %v4075_v21 = vld [vmem:[%s4663_s1 + $0xa8] sm:$0xff] }
  0xf7   : > { %v340_v27 = vmax.f32 %v334_v23, 0.0 }
  0xf8   : > { %v339_v28 = vmax.f32 %v329_v25, 0.0  ;;  %3519 = vmatprep.subr.bf16.mxu1 %v3518_v26 }
  0xf9   : > { %3521 = vmatpush3.bf16.msra.mxu1 %v3518_v26 }
  0xfa   : > { %v3522_v29 = vpack.c.bf16 %v340_v27, %v339_v28 }
  0xfc   : > { %3523 = vmatprep.subr.bf16.mxu1 %v3522_v29 }
  0xfd   : > { %3525 = vmatpush3.bf16.msra.mxu1 %v3522_v29 }
 0x100   : > { %3199 = vmatmul.mubr.msk.f32.vlgmr.msra.gmra.mrb[0].mxu1 %vm357_vm1, %v3957_v30 }
 0x101   : > { %3201 = vmatprep.mubr.msk.f32.mxu1 %vm357_vm1, %v3962_v31 }
 0x104   : > { %3202 = vmatmul.mubr.msk.f32.gmra.mrb[2].mxu1 %vm357_vm1, %v3971_v32 }
 0x105   : > { %3221 = vmatprep.mubr.msk.f32.mxu1 %vm357_vm1, %v3978_v33 }
 0x1d3   : > { %v3200_v36 = vpop.f32.mrb[0].mxu1 }
 0x1d4   : > { %v442_v37 = vadd.f32 %v3200_v36, %v3984_v35  ;;  %v436_v38 = vpop.f32.mrb[1].mxu1 }
 0x1d5   : > { %v437_v39 = vadd.f32 %v436_v38, %v3982_v34 }
 0x1d6   : > { %v456_v40 = vmax.f32 %v442_v37, 0.0 }
 0x1d7   : > { %v455_v42 = vmax.f32 %v437_v39, 0.0  ;;  %v3203_v43 = vpop.f32.mrb[2].mxu1 }
 0x1d8   : > { %v452_v45 = vadd.f32 %v3203_v43, %v3988_v41  ;;  %v446_v46 = vpop.f32.mrb[3].mxu1 }
 0x1d9   : > { %v3526_v47 = vpack.c.bf16 %v456_v40, %v455_v42  ;;  %v447_v48 = vadd.f32 %v446_v46, %v3990_v44 }
 0x1da   : > { %v458_v49 = vmax.f32 %v452_v45, 0.0 }
 0x1db   : > { %v457_v50 = vmax.f32 %v447_v48, 0.0  ;;  %3527 = vmatprep.subr.bf16.mxu0 %v3526_v47  ;;  %3646 = vmatprep.subr.bf16.mxu1 %v3526_v47 }
 0x1dc   : > { %3529 = vmatpush3.bf16.msra.mxu0 %v3526_v47  ;;  %3648 = vmatpush3.bf16.msra.mxu1 %v3526_v47 }
 0x1dd   : > { %v3530_v51 = vpack.c.bf16 %v458_v49, %v457_v50 }
 0x1df   : > { %3531 = vmatprep.subr.bf16.mxu0 %v3530_v51  ;;  %3647 = vmatprep.subr.bf16.mxu1 %v3530_v51 }
 0x1e0   : > { %3533 = vmatpush3.bf16.msra.mxu0 %v3530_v51  ;;  %3649 = vmatpush3.bf16.msra.mxu1 %v3530_v51 }
 0x1e1   : > { %3224 = vmatprep.subr.mxu1 %v2856_v52 }
 0x1e3   : > { %3222 = vmatmul.mubr.msk.f32.vlgmr.msra.gmra.mrb[4].mxu1 %vm357_vm1, %v3998_v53  ;;  %3213 = vmatmul.mubr.msk.f32.vlgmr.msra.gmra.mrb[4].mxu0 %vm357_vm1, %v4047_v16 }
 0x1e4   : > { %3225 = vmatpush3.msra.mxu1 %v2856_v52  ;;  %3226 = vmatprep.mubr.msk.f32.mxu1 %vm239_vm0, %v3891_v0 }
 0x1e5   : > { %3215 = vmatprep.mubr.msk.f32.mxu0 %vm357_vm1, %v4054_v17 }
 0x1e7   : > { %3227 = vmatmul.mubr.msk.f32.vlgmr.msra.gmra.mrb[6].mxu1 %vm239_vm0, %v3917_v7  ;;  %3216 = vmatmul.mubr.msk.f32.gmra.mrb[6].mxu0 %vm357_vm1, %v4061_v18 }
 0x1e8   : > { %3229 = vmatprep.mubr.msk.f32.mxu1 %vm239_vm0, %v3922_v8  ;;  %3218 = vmatprep.mubr.msk.f32.mxu0 %vm357_vm1, %v4068_v19 }
 0x1eb   : > { %3230 = vmatmul.mubr.msk.f32.gmra.mrb[8].mxu1 %vm239_vm0, %v3931_v9  ;;  %3219 = vmatmul.mubr.msk.f32.gmra.mrb[8].mxu0 %vm357_vm1, %v4075_v21 }
 0x1ec   : > { %3240 = vmatprep.mubr.msk.f32.mxu1 %vm357_vm1, %v3938_v10  ;;  %3254 = vmatprep.mubr.msk.f32.mxu0 %vm357_vm1, %v4040_v15 }
 0x2b6   : > { %v4012_v54 = vpop.f32.mrb[4].mxu1 }
 0x2b7   : > { %v4014_v55 = vpop.f32.mrb[5].mxu1 }
 0x2ba   : > { %v3228_v56 = vpop.f32.mrb[6].mxu1 }
 0x2bb   : > { %v662_v57 = vadd.f32 %v3228_v56, %v3946_v14  ;;  %v656_v58 = vpop.f32.mrb[7].mxu1 }
 0x2bc   : > { %v657_v59 = vadd.f32 %v656_v58, %v3942_v12 }
 0x2bd   : > { %v676_v60 = vmax.f32 %v662_v57, 0.0 }
 0x2be   : > { %v675_v61 = vmax.f32 %v657_v59, 0.0  ;;  %v3231_v62 = vpop.f32.mrb[8].mxu1 }
 0x2bf   : > { %v672_v63 = vadd.f32 %v3231_v62, %v3950_v20  ;;  %v666_v1 = vpop.f32.mrb[9].mxu1  ;;  %v4122_v62 = vpop.f32.mrb[4].mxu0 }
 0x2c0   : > { %v3534_v2 = vpack.c.bf16 %v676_v60, %v675_v61  ;;  %v667_v3 = vadd.f32 %v666_v1, %v3944_v13  ;;  %v2890_v61 = vld [vmem:[%s3911_s19 + $0x18] sm:$0xff] }
 0x2c1   : > { %v678_v4 = vmax.f32 %v672_v63, 0.0  ;;  %v4124_v63 = vpop.f32.mrb[5].mxu0 }
 0x2c2   : > { %v677_v5 = vmax.f32 %v667_v3, 0.0  ;;  %3535 = vmatprep.subr.bf16.mxu1 %v3534_v2  ;;  %v4126_v1 = vpop.f32.mrb[6].mxu0 }
 0x2c3   : > { %3537 = vmatpush3.bf16.msra.mxu1 %v3534_v2  ;;  %v4128_v2 = vpop.f32.mrb[7].mxu0 }
 0x2c4   : > { %v3538_v6 = vpack.c.bf16 %v678_v4, %v677_v5  ;;  %v4130_v3 = vpop.f32.mrb[8].mxu0 }
 0x2c5   : > { %v4132_v4 = vpop.f32.mrb[9].mxu0 }
 0x2c6   : > { %3539 = vmatprep.subr.bf16.mxu1 %v3538_v6 }
 0x2c7   : > { %3541 = vmatpush3.bf16.msra.mxu1 %v3538_v6 }
 0x2c8   : > { %3266 = vmatprep.subr.mxu1 %v2873_v11 }
 0x2ca   : > { %3241 = vmatmul.mubr.msk.f32.vlgmr.msra.gmra.mrb[10].mxu1 %vm357_vm1, %v3957_v30 }
 0x2cb   : > { %3243 = vmatprep.mubr.msk.f32.mxu1 %vm357_vm1, %v3962_v31  ;;  %3267 = vmatpush3.msra.mxu1 %v2873_v11 }
 0x2ce   : > { %3244 = vmatmul.mubr.msk.f32.gmra.mrb[12].mxu1 %vm357_vm1, %v3971_v32 }
 0x2cf   : > { %3268 = vmatprep.mubr.msk.f32.mxu1 %vm239_vm0, %v3891_v0 }
 0x2d2   : > { %3269 = vmatmul.mubr.msk.f32.vlgmr.msra.gmra.mrb[14].mxu1 %vm239_vm0, %v3917_v7 }
 0x2d3   : > { %3271 = vmatprep.mubr.msk.f32.mxu1 %vm239_vm0, %v3922_v8 }
 0x2d6   : > { %3272 = vmatmul.mubr.msk.f32.gmra.mrb[16].mxu1 %vm239_vm0, %v3931_v9 }
 0x2d7   : > { %3282 = vmatprep.mubr.msk.f32.mxu1 %vm357_vm1, %v3938_v10 }
 0x39d   : > { %v3242_v22 = vpop.f32.mrb[10].mxu1 }
 0x39e   : > { %v751_v23 = vadd.f32 %v3242_v22, %v3984_v35  ;;  %v745_v24 = vpop.f32.mrb[11].mxu1 }
 0x39f   : > { %v746_v25 = vadd.f32 %v745_v24, %v3982_v34 }
 0x3a0   : > { %v765_v26 = vmax.f32 %v751_v23, 0.0 }
 0x3a1   : > { %v764_v27 = vmax.f32 %v746_v25, 0.0  ;;  %v3245_v28 = vpop.f32.mrb[12].mxu1 }
 0x3a2   : > { %v761_v29 = vadd.f32 %v3245_v28, %v3988_v41  ;;  %v755_v36 = vpop.f32.mrb[13].mxu1 }
 0x3a3   : > { %v3542_v37 = vpack.c.bf16 %v765_v26, %v764_v27  ;;  %v756_v38 = vadd.f32 %v755_v36, %v3990_v44 }
 0x3a4   : > { %v767_v39 = vmax.f32 %v761_v29, 0.0 }
 0x3a5   : > { %v766_v40 = vmax.f32 %v756_v38, 0.0  ;;  %3543 = vmatprep.subr.bf16.mxu0 %v3542_v37  ;;  %v3270_v42 = vpop.f32.mrb[14].mxu1 }
 0x3a6   : > { %v955_v43 = vadd.f32 %v3270_v42, %v3946_v14  ;;  %3545 = vmatpush3.bf16.msra.mxu0 %v3542_v37  ;;  %v949_v45 = vpop.f32.mrb[15].mxu1 }
 0x3a7   : > { %v3546_v46 = vpack.c.bf16 %v767_v39, %v766_v40  ;;  %v950_v47 = vadd.f32 %v949_v45, %v3942_v12 }
 0x3a8   : > { %v969_v48 = vmax.f32 %v955_v43, 0.0 }
 0x3a9   : > { %v968_v49 = vmax.f32 %v950_v47, 0.0  ;;  %3547 = vmatprep.subr.bf16.mxu0 %v3546_v46  ;;  %v3273_v50 = vpop.f32.mrb[16].mxu1 }
 0x3aa   : > { %v965_v51 = vadd.f32 %v3273_v50, %v3950_v20  ;;  %3549 = vmatpush3.bf16.msra.mxu0 %v3546_v46  ;;  %v959_v52 = vpop.f32.mrb[17].mxu1 }
 0x3ab   : > { %v3550_v56 = vpack.c.bf16 %v969_v48, %v968_v49  ;;  %v960_v57 = vadd.f32 %v959_v52, %v3944_v13 }
 0x3ac   : > { %v971_v58 = vmax.f32 %v965_v51, 0.0 }
 0x3ad   : > { %v970_v59 = vmax.f32 %v960_v57, 0.0  ;;  %3255 = vmatmul.mubr.msk.f32.vlgmr.msra.gmra.mrb[10].mxu0 %vm357_vm1, %v4047_v16  ;;  %3551 = vmatprep.subr.bf16.mxu1 %v3550_v56 }
 0x3ae   : > { %3553 = vmatpush3.bf16.msra.mxu1 %v3550_v56  ;;  %3257 = vmatprep.mubr.msk.f32.mxu0 %vm357_vm1, %v4054_v17 }
 0x3af   : > { %v3554_v60 = vpack.c.bf16 %v971_v58, %v970_v59 }
 0x3b1   : > { %3258 = vmatmul.mubr.msk.f32.gmra.mrb[12].mxu0 %vm357_vm1, %v4061_v18  ;;  %3555 = vmatprep.subr.bf16.mxu1 %v3554_v60 }
 0x3b2   : > { %3557 = vmatpush3.bf16.msra.mxu1 %v3554_v60  ;;  %3260 = vmatprep.mubr.msk.f32.mxu0 %vm357_vm1, %v4068_v19 }
 0x3b3   : > { %3308 = vmatprep.subr.mxu1 %v2890_v61 }
 0x3b5   : > { %3261 = vmatmul.mubr.msk.f32.gmra.mrb[14].mxu0 %vm357_vm1, %v4075_v21  ;;  %3283 = vmatmul.mubr.msk.f32.vlgmr.msra.gmra.mrb[18].mxu1 %vm357_vm1, %v3957_v30 }
 0x3b6   : > { %3263 = vmatprep.mubr.msk.f32.mxu0 %vm357_vm1, %v3978_v33  ;;  %3285 = vmatprep.mubr.msk.f32.mxu1 %vm357_vm1, %v3962_v31 }
 0x3b7   : > { %3309 = vmatpush3.msra.mxu1 %v2890_v61 }
 0x3b9   : > { %3264 = vmatmul.mubr.msk.f32.gmra.mrb[16].mxu0 %vm357_vm1, %v3998_v53  ;;  %3286 = vmatmul.mubr.msk.f32.gmra.mrb[20].mxu1 %vm357_vm1, %v3971_v32 }
 0x3ba   : > { %3310 = vmatprep.mubr.msk.f32.mxu1 %vm239_vm0, %v3891_v0  ;;  %3296 = vmatprep.mubr.msk.f32.mxu0 %vm357_vm1, %v4040_v15 }
 0x3bd   : > { %3311 = vmatmul.mubr.msk.f32.vlgmr.msra.gmra.mrb[22].mxu1 %vm239_vm0, %v3917_v7 }
 0x3be   : > { %3313 = vmatprep.mubr.msk.f32.mxu1 %vm239_vm0, %v3922_v8 }
 0x3c1   : > { %3314 = vmatmul.mubr.msk.f32.gmra.mrb[24].mxu1 %vm239_vm0, %v3931_v9 }
 0x3c2   : > { %3324 = vmatprep.mubr.msk.f32.mxu1 %vm357_vm1, %v3938_v10 }
 0x480   : > { %v4134_v5 = vpop.f32.mrb[10].mxu0 }
 0x481   : > { %v874_v6 = vmax.f32 %v4122_v62, %v4134_v5  ;;  %v4138_v11 = vpop.f32.mrb[11].mxu0 }
 0x482   : > { %v873_v22 = vmax.f32 %v4124_v63, %v4138_v11 }
 0x484   : > { %v4142_v23 = vpop.f32.mrb[12].mxu0 }
 0x485   : > { %v876_v24 = vmax.f32 %v4126_v1, %v4142_v23  ;;  %v4146_v25 = vpop.f32.mrb[13].mxu0 }
 0x486   : > { %v875_v26 = vmax.f32 %v4128_v2, %v4146_v25 }
 0x488   : > { %v3284_v27 = vpop.f32.mrb[18].mxu1  ;;  %v4150_v28 = vpop.f32.mrb[14].mxu0 }
 0x489   : > { %v1044_v29 = vadd.f32 %v3284_v27, %v3984_v35  ;;  %v1038_v36 = vpop.f32.mrb[19].mxu1  ;;  %v878_v37 = vmax.f32 %v4130_v3, %v4150_v28  ;;  %v4155_v38 = vpop.f32.mrb[15].mxu0 }
 0x48a   : > { %v1039_v39 = vadd.f32 %v1038_v36, %v3982_v34  ;;  %v877_v40 = vmax.f32 %v4132_v4, %v4155_v38 }
 0x48b   : > { %v1058_v42 = vmax.f32 %v1044_v29, 0.0 }
 0x48c   : > { %v1057_v43 = vmax.f32 %v1039_v39, 0.0  ;;  %v4160_v45 = vpop.f32.mrb[16].mxu0  ;;  %v3287_v46 = vpop.f32.mrb[20].mxu1 }
 0x48d   : > { %v880_v47 = vmax.f32 %v4012_v54, %v4160_v45  ;;  %v1054_v48 = vadd.f32 %v3287_v46, %v3988_v41  ;;  %v4165_v49 = vpop.f32.mrb[17].mxu0  ;;  %v1048_v50 = vpop.f32.mrb[21].mxu1 }
 0x48e   : > { %v3558_v51 = vpack.c.bf16 %v1058_v42, %v1057_v43  ;;  %v1049_v56 = vadd.f32 %v1048_v50, %v3990_v44 }
 0x48f   : > { %v1060_v57 = vmax.f32 %v1054_v48, 0.0 }
 0x490   : > { %v1059_v58 = vmax.f32 %v1049_v56, 0.0  ;;  %3559 = vmatprep.subr.bf16.mxu0 %v3558_v51  ;;  %v3312_v59 = vpop.f32.mrb[22].mxu1 }
 0x491   : > { %v1248_v60 = vadd.f32 %v3312_v59, %v3946_v14  ;;  %3561 = vmatpush3.bf16.msra.mxu0 %v3558_v51  ;;  %v1242_v61 = vpop.f32.mrb[23].mxu1 }
 0x492   : > { %v3562_v27 = vpack.c.bf16 %v1060_v57, %v1059_v58  ;;  %v1243_v29 = vadd.f32 %v1242_v61, %v3942_v12  ;;  %v2907_v57 = vld [vmem:[%s3911_s19 + $0x20] sm:$0xff] }
 0x493   : > { %v1262_v36 = vmax.f32 %v1248_v60, 0.0 }
 0x494   : > { %v1261_v39 = vmax.f32 %v1243_v29, 0.0  ;;  %3563 = vmatprep.subr.bf16.mxu0 %v3562_v27  ;;  %v3315_v42 = vpop.f32.mrb[24].mxu1 }
 0x495   : > { %v1258_v43 = vadd.f32 %v3315_v42, %v3950_v20  ;;  %3565 = vmatpush3.bf16.msra.mxu0 %v3562_v27  ;;  %v1252_v46 = vpop.f32.mrb[25].mxu1 }
 0x496   : > { %v3566_v48 = vpack.c.bf16 %v1262_v36, %v1261_v39  ;;  %v1253_v50 = vadd.f32 %v1252_v46, %v3944_v13 }
 0x497   : > { %v1264_v56 = vmax.f32 %v1258_v43, 0.0  ;;  %v4668_v43 = vmax.f32 %v4014_v55, %v4165_v49 }
 0x498   : > { %v1263_v52 = vmax.f32 %v1253_v50, 0.0  ;;  %3297 = vmatmul.mubr.msk.f32.vlgmr.msra.gmra.mrb[18].mxu0 %vm357_vm1, %v4047_v16  ;;  %3567 = vmatprep.subr.bf16.mxu1 %v3566_v48 }
 0x499   : > { %3569 = vmatpush3.bf16.msra.mxu1 %v3566_v48  ;;  %3299 = vmatprep.mubr.msk.f32.mxu0 %vm357_vm1, %v4054_v17 }
 0x49a   : > { %v3570_v51 = vpack.c.bf16 %v1264_v56, %v1263_v52 }
 0x49c   : > { %3300 = vmatmul.mubr.msk.f32.gmra.mrb[20].mxu0 %vm357_vm1, %v4061_v18  ;;  %3571 = vmatprep.subr.bf16.mxu1 %v3570_v51 }
 0x49d   : > { %3573 = vmatpush3.bf16.msra.mxu1 %v3570_v51  ;;  %3302 = vmatprep.mubr.msk.f32.mxu0 %vm357_vm1, %v4068_v19 }
 0x49e   : > { %3350 = vmatprep.subr.mxu1 %v2907_v57 }
 0x4a0   : > { %3303 = vmatmul.mubr.msk.f32.gmra.mrb[22].mxu0 %vm357_vm1, %v4075_v21  ;;  %3325 = vmatmul.mubr.msk.f32.vlgmr.msra.gmra.mrb[26].mxu1 %vm357_vm1, %v3957_v30 }
 0x4a1   : > { %3305 = vmatprep.mubr.msk.f32.mxu0 %vm357_vm1, %v3978_v33  ;;  %3327 = vmatprep.mubr.msk.f32.mxu1 %vm357_vm1, %v3962_v31 }
 0x4a2   : > { %3351 = vmatpush3.msra.mxu1 %v2907_v57 }
 0x4a4   : > { %3306 = vmatmul.mubr.msk.f32.gmra.mrb[24].mxu0 %vm357_vm1, %v3998_v53  ;;  %3328 = vmatmul.mubr.msk.f32.gmra.mrb[28].mxu1 %vm357_vm1, %v3971_v32 }
 0x4a5   : > { %3352 = vmatprep.mubr.msk.f32.mxu1 %vm239_vm0, %v3891_v0  ;;  %3338 = vmatprep.mubr.msk.f32.mxu0 %vm357_vm1, %v4040_v15 }
 0x4a8   : > { %3353 = vmatmul.mubr.msk.f32.vlgmr.msra.gmra.mrb[30].mxu1 %vm239_vm0, %v3917_v7 }
 0x4a9   : > { %3355 = vmatprep.mubr.msk.f32.mxu1 %vm239_vm0, %v3922_v8 }
 0x4ac   : > { %3356 = vmatmul.mubr.msk.f32.gmra.mrb[32].mxu1 %vm239_vm0, %v3931_v9 }
 0x4ad   : > { %3366 = vmatprep.mubr.msk.f32.mxu1 %vm357_vm1, %v3938_v10 }
 0x56b   : > { %v3298_v52 = vpop.f32.mrb[18].mxu0 }
 0x56c   : > { %v4210_v58 = vmax.f32 %v874_v6, %v3298_v52  ;;  %v1127_v59 = vpop.f32.mrb[19].mxu0 }
 0x56d   : > { %v4215_v60 = vmax.f32 %v873_v22, %v1127_v59 }
 0x56f   : > { %v3301_v61 = vpop.f32.mrb[20].mxu0 }
 0x570   : > { %v4220_v27 = vmax.f32 %v876_v24, %v3301_v61  ;;  %v1137_v29 = vpop.f32.mrb[21].mxu0 }
 0x571   : > { %v4225_v36 = vmax.f32 %v875_v26, %v1137_v29 }
 0x573   : > { %v3326_v62 = vpop.f32.mrb[26].mxu1  ;;  %v3304_v5 = vpop.f32.mrb[22].mxu0 }
 0x574   : > { %v1337_v6 = vadd.f32 %v3326_v62, %v3984_v35  ;;  %v1331_v39 = vpop.f32.mrb[27].mxu1  ;;  %v4231_v63 = vmax.f32 %v878_v37, %v3304_v5  ;;  %v1147_v11 = vpop.f32.mrb[23].mxu0  ;;  %v2924_v5 = vld [vmem:[%s3911_s19 + $0x28] sm:$0xff] }
 0x575   : > { %v1332_v1 = vadd.f32 %v1331_v39, %v3982_v34  ;;  %v4237_v22 = vmax.f32 %v877_v40, %v1147_v11 }
 0x576   : > { %v1351_v2 = vmax.f32 %v1337_v6, 0.0 }
 0x577   : > { %v1350_v23 = vmax.f32 %v1332_v1, 0.0  ;;  %v3307_v24 = vpop.f32.mrb[24].mxu0  ;;  %v3329_v25 = vpop.f32.mrb[28].mxu1 }
 0x578   : > { %v4242_v26 = vmax.f32 %v880_v47, %v3307_v24  ;;  %v1347_v3 = vadd.f32 %v3329_v25, %v3988_v41  ;;  %v1157_v28 = vpop.f32.mrb[25].mxu0  ;;  %v1341_v37 = vpop.f32.mrb[29].mxu1 }
 0x579   : > { %v3574_v42 = vpack.c.bf16 %v1351_v2, %v1350_v23  ;;  %v4248_v4 = vmax.f32 %v4668_v43, %v1157_v28  ;;  %v1342_v38 = vadd.f32 %v1341_v37, %v3990_v44 }
 0x57a   : > { %v1353_v40 = vmax.f32 %v1347_v3, 0.0 }
 0x57b   : > { %v1352_v46 = vmax.f32 %v1342_v38, 0.0  ;;  %3575 = vmatprep.subr.bf16.mxu0 %v3574_v42  ;;  %v3354_v48 = vpop.f32.mrb[30].mxu1 }
 0x57c   : > { %v1541_v54 = vadd.f32 %v3354_v48, %v3946_v14  ;;  %3577 = vmatpush3.bf16.msra.mxu0 %v3574_v42  ;;  %v1535_v45 = vpop.f32.mrb[31].mxu1 }
 0x57d   : > { %v3578_v47 = vpack.c.bf16 %v1353_v40, %v1352_v46  ;;  %v1536_v50 = vadd.f32 %v1535_v45, %v3942_v12 }
 0x57e   : > { %v1555_v56 = vmax.f32 %v1541_v54, 0.0 }
 0x57f   : > { %v1554_v51 = vmax.f32 %v1536_v50, 0.0  ;;  %3579 = vmatprep.subr.bf16.mxu0 %v3578_v47  ;;  %v3357_v55 = vpop.f32.mrb[32].mxu1 }
 0x580   : > { %v1551_v49 = vadd.f32 %v3357_v55, %v3950_v20  ;;  %3581 = vmatpush3.bf16.msra.mxu0 %v3578_v47  ;;  %v1545_v57 = vpop.f32.mrb[33].mxu1 }
 0x581   : > { %v3582_v52 = vpack.c.bf16 %v1555_v56, %v1554_v51  ;;  %v1546_v59 = vadd.f32 %v1545_v57, %v3944_v13 }
 0x582   : > { %v1557_v61 = vmax.f32 %v1551_v49, 0.0 }
 0x583   : > { %v1556_v29 = vmax.f32 %v1546_v59, 0.0  ;;  %3339 = vmatmul.mubr.msk.f32.vlgmr.msra.gmra.mrb[26].mxu0 %vm357_vm1, %v4047_v16  ;;  %3583 = vmatprep.subr.bf16.mxu1 %v3582_v52 }
 0x584   : > { %3585 = vmatpush3.bf16.msra.mxu1 %v3582_v52  ;;  %3341 = vmatprep.mubr.msk.f32.mxu0 %vm357_vm1, %v4054_v17 }
 0x585   : > { %v3586_v62 = vpack.c.bf16 %v1557_v61, %v1556_v29 }
 0x587   : > { %3342 = vmatmul.mubr.msk.f32.gmra.mrb[28].mxu0 %vm357_vm1, %v4061_v18  ;;  %3587 = vmatprep.subr.bf16.mxu1 %v3586_v62 }
 0x588   : > { %3589 = vmatpush3.bf16.msra.mxu1 %v3586_v62  ;;  %3344 = vmatprep.mubr.msk.f32.mxu0 %vm357_vm1, %v4068_v19 }
 0x589   : > { %3392 = vmatprep.subr.mxu1 %v2924_v5 }
 0x58b   : > { %3345 = vmatmul.mubr.msk.f32.gmra.mrb[30].mxu0 %vm357_vm1, %v4075_v21  ;;  %3367 = vmatmul.mubr.msk.f32.vlgmr.msra.gmra.mrb[34].mxu1 %vm357_vm1, %v3957_v30 }
 0x58c   : > { %3347 = vmatprep.mubr.msk.f32.mxu0 %vm357_vm1, %v3978_v33  ;;  %3369 = vmatprep.mubr.msk.f32.mxu1 %vm357_vm1, %v3962_v31 }
 0x58d   : > { %3393 = vmatpush3.msra.mxu1 %v2924_v5 }
 0x58f   : > { %3348 = vmatmul.mubr.msk.f32.gmra.mrb[32].mxu0 %vm357_vm1, %v3998_v53  ;;  %3370 = vmatmul.mubr.msk.f32.gmra.mrb[36].mxu1 %vm357_vm1, %v3971_v32 }
 0x590   : > { %3394 = vmatprep.mubr.msk.f32.mxu1 %vm239_vm0, %v3891_v0  ;;  %3380 = vmatprep.mubr.msk.f32.mxu0 %vm357_vm1, %v4040_v15 }
 0x593   : > { %3395 = vmatmul.mubr.msk.f32.vlgmr.msra.gmra.mrb[38].mxu1 %vm239_vm0, %v3917_v7 }
 0x594   : > { %3397 = vmatprep.mubr.msk.f32.mxu1 %vm239_vm0, %v3922_v8 }
 0x597   : > { %3398 = vmatmul.mubr.msk.f32.gmra.mrb[40].mxu1 %vm239_vm0, %v3931_v9 }
 0x598   : > { %3408 = vmatprep.mubr.msk.f32.mxu1 %vm357_vm1, %v3938_v10 }
 0x656   : > { %v4288_v6 = vpop.f32.mrb[26].mxu0 }
 0x657   : > { %v1460_v39 = vmax.f32 %v4210_v58, %v4288_v6  ;;  %v4292_v11 = vpop.f32.mrb[27].mxu0 }
 0x658   : > { %v1459_v1 = vmax.f32 %v4215_v60, %v4292_v11 }
 0x65a   : > { %v4296_v2 = vpop.f32.mrb[28].mxu0 }
 0x65b   : > { %v1462_v23 = vmax.f32 %v4220_v27, %v4296_v2  ;;  %v4300_v24 = vpop.f32.mrb[29].mxu0 }
 0x65c   : > { %v1461_v25 = vmax.f32 %v4225_v36, %v4300_v24 }
 0x65e   : > { %v3368_v3 = vpop.f32.mrb[34].mxu1  ;;  %v4304_v28 = vpop.f32.mrb[30].mxu0 }
 0x65f   : > { %v1630_v37 = vadd.f32 %v3368_v3, %v3984_v35  ;;  %v1624_v42 = vpop.f32.mrb[35].mxu1  ;;  %v1464_v43 = vmax.f32 %v4231_v63, %v4304_v28  ;;  %v4309_v38 = vpop.f32.mrb[31].mxu0 }
 0x660   : > { %v1625_v40 = vadd.f32 %v1624_v42, %v3982_v34  ;;  %v1463_v46 = vmax.f32 %v4237_v22, %v4309_v38 }
 0x661   : > { %v1644_v48 = vmax.f32 %v1630_v37, 0.0 }
 0x662   : > { %v1643_v54 = vmax.f32 %v1625_v40, 0.0  ;;  %v4314_v45 = vpop.f32.mrb[32].mxu0  ;;  %v3371_v47 = vpop.f32.mrb[36].mxu1 }
 0x663   : > { %v1466_v50 = vmax.f32 %v4242_v26, %v4314_v45  ;;  %v1640_v56 = vadd.f32 %v3371_v47, %v3988_v41  ;;  %v4319_v51 = vpop.f32.mrb[33].mxu0  ;;  %v1634_v55 = vpop.f32.mrb[37].mxu1 }
 0x664   : > { %v3590_v49 = vpack.c.bf16 %v1644_v48, %v1643_v54  ;;  %v1635_v52 = vadd.f32 %v1634_v55, %v3990_v44 }
 0x665   : > { %v1646_v59 = vmax.f32 %v1640_v56, 0.0 }
 0x666   : > { %v1645_v61 = vmax.f32 %v1635_v52, 0.0  ;;  %3591 = vmatprep.subr.bf16.mxu0 %v3590_v49  ;;  %v3396_v29 = vpop.f32.mrb[38].mxu1 }
 0x667   : > { %v1834_v62 = vadd.f32 %v3396_v29, %v3946_v14  ;;  %3593 = vmatpush3.bf16.msra.mxu0 %v3590_v49  ;;  %v1828_v5 = vpop.f32.mrb[39].mxu1 }
 0x668   : > { %v3594_v3 = vpack.c.bf16 %v1646_v59, %v1645_v61  ;;  %v1829_v37 = vadd.f32 %v1828_v5, %v3942_v12  ;;  %v2941_v59 = vld [vmem:[%s3911_s19 + $0x30] sm:$0xff] }
 0x669   : > { %v1848_v42 = vmax.f32 %v1834_v62, 0.0 }
 0x66a   : > { %v1847_v40 = vmax.f32 %v1829_v37, 0.0  ;;  %3595 = vmatprep.subr.bf16.mxu0 %v3594_v3  ;;  %v3399_v48 = vpop.f32.mrb[40].mxu1 }
 0x66b   : > { %v1844_v54 = vadd.f32 %v3399_v48, %v3950_v20  ;;  %3597 = vmatpush3.bf16.msra.mxu0 %v3594_v3  ;;  %v1838_v47 = vpop.f32.mrb[41].mxu1 }
 0x66c   : > { %v3598_v56 = vpack.c.bf16 %v1848_v42, %v1847_v40  ;;  %v1839_v55 = vadd.f32 %v1838_v47, %v3944_v13 }
 0x66d   : > { %v1850_v52 = vmax.f32 %v1844_v54, 0.0  ;;  %v4669_v54 = vmax.f32 %v4248_v4, %v4319_v51 }
 0x66e   : > { %v1849_v57 = vmax.f32 %v1839_v55, 0.0  ;;  %3381 = vmatmul.mubr.msk.f32.vlgmr.msra.gmra.mrb[34].mxu0 %vm357_vm1, %v4047_v16  ;;  %3599 = vmatprep.subr.bf16.mxu1 %v3598_v56 }
 0x66f   : > { %3601 = vmatpush3.bf16.msra.mxu1 %v3598_v56  ;;  %3383 = vmatprep.mubr.msk.f32.mxu0 %vm357_vm1, %v4054_v17 }
 0x670   : > { %v3602_v49 = vpack.c.bf16 %v1850_v52, %v1849_v57 }
 0x672   : > { %3384 = vmatmul.mubr.msk.f32.gmra.mrb[36].mxu0 %vm357_vm1, %v4061_v18  ;;  %3603 = vmatprep.subr.bf16.mxu1 %v3602_v49 }
 0x673   : > { %3605 = vmatpush3.bf16.msra.mxu1 %v3602_v49  ;;  %3386 = vmatprep.mubr.msk.f32.mxu0 %vm357_vm1, %v4068_v19 }
 0x674   : > { %3434 = vmatprep.subr.mxu1 %v2941_v59 }
 0x676   : > { %3387 = vmatmul.mubr.msk.f32.gmra.mrb[38].mxu0 %vm357_vm1, %v4075_v21  ;;  %3409 = vmatmul.mubr.msk.f32.vlgmr.msra.gmra.mrb[42].mxu1 %vm357_vm1, %v3957_v30 }
 0x677   : > { %3389 = vmatprep.mubr.msk.f32.mxu0 %vm357_vm1, %v3978_v33  ;;  %3411 = vmatprep.mubr.msk.f32.mxu1 %vm357_vm1, %v3962_v31 }
 0x678   : > { %3435 = vmatpush3.msra.mxu1 %v2941_v59 }
 0x67a   : > { %3390 = vmatmul.mubr.msk.f32.gmra.mrb[40].mxu0 %vm357_vm1, %v3998_v53  ;;  %3412 = vmatmul.mubr.msk.f32.gmra.mrb[44].mxu1 %vm357_vm1, %v3971_v32 }
 0x67b   : > { %3436 = vmatprep.mubr.msk.f32.mxu1 %vm239_vm0, %v3891_v0  ;;  %3422 = vmatprep.mubr.msk.f32.mxu0 %vm357_vm1, %v4040_v15 }
 0x67e   : > { %3437 = vmatmul.mubr.msk.f32.vlgmr.msra.gmra.mrb[46].mxu1 %vm239_vm0, %v3917_v7 }
 0x67f   : > { %3439 = vmatprep.mubr.msk.f32.mxu1 %vm239_vm0, %v3922_v8 }
 0x682   : > { %3440 = vmatmul.mubr.msk.f32.gmra.mrb[48].mxu1 %vm239_vm0, %v3931_v9 }
 0x683   : > { %3450 = vmatprep.mubr.msk.f32.mxu1 %vm357_vm1, %v3938_v10 }
 0x741   : > { %v3382_v57 = vpop.f32.mrb[34].mxu0 }
 0x742   : > { %v4364_v61 = vmax.f32 %v1460_v39, %v3382_v57  ;;  %v1713_v29 = vpop.f32.mrb[35].mxu0 }
 0x743   : > { %v4369_v62 = vmax.f32 %v1459_v1, %v1713_v29 }
 0x745   : > { %v3385_v5 = vpop.f32.mrb[36].mxu0 }
 0x746   : > { %v4374_v3 = vmax.f32 %v1462_v23, %v3385_v5  ;;  %v1723_v37 = vpop.f32.mrb[37].mxu0 }
 0x747   : > { %v4379_v42 = vmax.f32 %v1461_v25, %v1723_v37 }
 0x749   : > { %v3410_v58 = vpop.f32.mrb[42].mxu1  ;;  %v3388_v6 = vpop.f32.mrb[38].mxu0 }
 0x74a   : > { %v1923_v39 = vadd.f32 %v3410_v58, %v3984_v35  ;;  %v1917_v40 = vpop.f32.mrb[43].mxu1  ;;  %v4385_v60 = vmax.f32 %v1464_v43, %v3388_v6  ;;  %v1733_v11 = vpop.f32.mrb[39].mxu0  ;;  %v2958_v6 = vld [vmem:[%s3911_s19 + $0x38] sm:$0xff] }
 0x74b   : > { %v1918_v27 = vadd.f32 %v1917_v40, %v3982_v34  ;;  %v4391_v1 = vmax.f32 %v1463_v46, %v1733_v11 }
 0x74c   : > { %v1937_v36 = vmax.f32 %v1923_v39, 0.0 }
 0x74d   : > { %v1936_v2 = vmax.f32 %v1918_v27, 0.0  ;;  %v3391_v23 = vpop.f32.mrb[40].mxu0  ;;  %v3413_v24 = vpop.f32.mrb[44].mxu1 }
 0x74e   : > { %v4396_v25 = vmax.f32 %v1466_v50, %v3391_v23  ;;  %v1933_v63 = vadd.f32 %v3413_v24, %v3988_v41  ;;  %v1743_v28 = vpop.f32.mrb[41].mxu0  ;;  %v1927_v43 = vpop.f32.mrb[45].mxu1 }
 0x74f   : > { %v3606_v48 = vpack.c.bf16 %v1937_v36, %v1936_v2  ;;  %v4402_v22 = vmax.f32 %v4669_v54, %v1743_v28  ;;  %v1928_v38 = vadd.f32 %v1927_v43, %v3990_v44 }
 0x750   : > { %v1939_v46 = vmax.f32 %v1933_v63, 0.0 }
 0x751   : > { %v1938_v47 = vmax.f32 %v1928_v38, 0.0  ;;  %3607 = vmatprep.subr.bf16.mxu0 %v3606_v48  ;;  %v3438_v56 = vpop.f32.mrb[46].mxu1 }
 0x752   : > { %v2127_v26 = vadd.f32 %v3438_v56, %v3946_v14  ;;  %3609 = vmatpush3.bf16.msra.mxu0 %v3606_v48  ;;  %v2121_v45 = vpop.f32.mrb[47].mxu1 }
 0x753   : > { %v3610_v50 = vpack.c.bf16 %v1939_v46, %v1938_v47  ;;  %v2122_v55 = vadd.f32 %v2121_v45, %v3942_v12 }
 0x754   : > { %v2141_v52 = vmax.f32 %v2127_v26, 0.0 }
 0x755   : > { %v2140_v49 = vmax.f32 %v2122_v55, 0.0  ;;  %3611 = vmatprep.subr.bf16.mxu0 %v3610_v50  ;;  %v3441_v4 = vpop.f32.mrb[48].mxu1 }
 0x756   : > { %v2137_v51 = vadd.f32 %v3441_v4, %v3950_v20  ;;  %3613 = vmatpush3.bf16.msra.mxu0 %v3610_v50  ;;  %v2131_v59 = vpop.f32.mrb[49].mxu1 }
 0x757   : > { %v3614_v57 = vpack.c.bf16 %v2141_v52, %v2140_v49  ;;  %v2132_v29 = vadd.f32 %v2131_v59, %v3944_v13 }
 0x758   : > { %v2143_v5 = vmax.f32 %v2137_v51, 0.0 }
 0x759   : > { %v2142_v37 = vmax.f32 %v2132_v29, 0.0  ;;  %3423 = vmatmul.mubr.msk.f32.vlgmr.msra.gmra.mrb[42].mxu0 %vm357_vm1, %v4047_v16  ;;  %3615 = vmatprep.subr.bf16.mxu1 %v3614_v57 }
 0x75a   : > { %3617 = vmatpush3.bf16.msra.mxu1 %v3614_v57  ;;  %3425 = vmatprep.mubr.msk.f32.mxu0 %vm357_vm1, %v4054_v17 }
 0x75b   : > { %v3618_v58 = vpack.c.bf16 %v2143_v5, %v2142_v37 }
 0x75d   : > { %3426 = vmatmul.mubr.msk.f32.gmra.mrb[44].mxu0 %vm357_vm1, %v4061_v18  ;;  %3619 = vmatprep.subr.bf16.mxu1 %v3618_v58 }
 0x75e   : > { %3621 = vmatpush3.bf16.msra.mxu1 %v3618_v58  ;;  %3428 = vmatprep.mubr.msk.f32.mxu0 %vm357_vm1, %v4068_v19 }
 0x75f   : > { %3476 = vmatprep.subr.mxu1 %v2958_v6 }
 0x761   : > { %3429 = vmatmul.mubr.msk.f32.gmra.mrb[46].mxu0 %vm357_vm1, %v4075_v21  ;;  %3451 = vmatmul.mubr.msk.f32.vlgmr.msra.gmra.mrb[50].mxu1 %vm357_vm1, %v3957_v30 }
 0x762   : > { %3431 = vmatprep.mubr.msk.f32.mxu0 %vm357_vm1, %v3978_v33  ;;  %3453 = vmatprep.mubr.msk.f32.mxu1 %vm357_vm1, %v3962_v31 }
 0x763   : > { %3477 = vmatpush3.msra.mxu1 %v2958_v6 }
 0x765   : > { %3432 = vmatmul.mubr.msk.f32.gmra.mrb[48].mxu0 %vm357_vm1, %v3998_v53  ;;  %3454 = vmatmul.mubr.msk.f32.gmra.mrb[52].mxu1 %vm357_vm1, %v3971_v32 }
 0x766   : > { %3478 = vmatprep.mubr.msk.f32.mxu1 %vm239_vm0, %v3891_v0  ;;  %3464 = vmatprep.mubr.msk.f32.mxu0 %vm357_vm1, %v4040_v15 }
 0x769   : > { %3479 = vmatmul.mubr.msk.f32.vlgmr.msra.gmra.mrb[54].mxu1 %vm239_vm0, %v3917_v7 }
 0x76a   : > { %3481 = vmatprep.mubr.msk.f32.mxu1 %vm239_vm0, %v3922_v8 }
 0x76d   : > { %3482 = vmatmul.mubr.msk.f32.gmra.mrb[56].mxu1 %vm239_vm0, %v3931_v9 }
 0x76e   : > { %3492 = vmatprep.mubr.msk.f32.mxu1 %vm357_vm1, %v3938_v10 }
 0x82c   : > { %v4442_v39 = vpop.f32.mrb[42].mxu0 }
 0x82d   : > { %v2046_v0 = vmax.f32 %v4364_v61, %v4442_v39  ;;  %v4446_v40 = vpop.f32.mrb[43].mxu0 }
 0x82e   : > { %v2045_v11 = vmax.f32 %v4369_v62, %v4446_v40 }
 0x830   : > { %v4450_v7 = vpop.f32.mrb[44].mxu0 }
 0x831   : > { %v2048_v8 = vmax.f32 %v4374_v3, %v4450_v7  ;;  %v4454_v27 = vpop.f32.mrb[45].mxu0 }
 0x832   : > { %v2047_v9 = vmax.f32 %v4379_v42, %v4454_v27 }
 0x834   : > { %v3452_v10 = vpop.f32.mrb[50].mxu1  ;;  %v4458_v36 = vpop.f32.mrb[46].mxu0 }
 0x835   : > { %v2216_v2 = vadd.f32 %v3452_v10, %v3984_v35  ;;  %v2210_v23 = vpop.f32.mrb[51].mxu1  ;;  %v2050_v24 = vmax.f32 %v4385_v60, %v4458_v36  ;;  %v4463_v63 = vpop.f32.mrb[47].mxu0 }
 0x836   : > { %v2211_v28 = vadd.f32 %v2210_v23, %v3982_v34  ;;  %v2049_v43 = vmax.f32 %v4391_v1, %v4463_v63 }
 0x837   : > { %v2230_v48 = vmax.f32 %v2216_v2, 0.0 }
 0x838   : > { %v2229_v54 = vmax.f32 %v2211_v28, 0.0  ;;  %v4468_v38 = vpop.f32.mrb[48].mxu0  ;;  %v3455_v46 = vpop.f32.mrb[52].mxu1 }
 0x839   : > { %v2052_v47 = vmax.f32 %v4396_v25, %v4468_v38  ;;  %v2226_v56 = vadd.f32 %v3455_v46, %v3988_v41  ;;  %v4473_v26 = vpop.f32.mrb[49].mxu0  ;;  %v2220_v45 = vpop.f32.mrb[53].mxu1  ;;  %v217_v46 = vld [vmem:[%s4664_s2 + $0x38] sm:$0xff] }
 0x83a   : > { %v3622_v50 = vpack.c.bf16 %v2230_v48, %v2229_v54  ;;  %v2051_v55 = vmax.f32 %v4402_v22, %v4473_v26  ;;  %v2221_v52 = vadd.f32 %v2220_v45, %v3990_v44 }
 0x83b   : > { %v2232_v49 = vmax.f32 %v2226_v56, 0.0 }
 0x83c   : > { %v2231_v4 = vmax.f32 %v2221_v52, 0.0  ;;  %3623 = vmatprep.subr.bf16.mxu0 %v3622_v50  ;;  %v3480_v51 = vpop.f32.mrb[54].mxu1 }
 0x83d   : > { %v2420_v59 = vadd.f32 %v3480_v51, %v3946_v14  ;;  %3625 = vmatpush3.bf16.msra.mxu0 %v3622_v50  ;;  %v2414_v57 = vpop.f32.mrb[55].mxu1  ;;  %v3719_v14 = vld [vmem:[%s4664_s2] sm:$0xff] }
 0x83e   : > { %v3626_v29 = vpack.c.bf16 %v2232_v49, %v2231_v4  ;;  %v2415_v5 = vadd.f32 %v2414_v57, %v3942_v12 }
 0x83f   : > { %v2434_v37 = vmax.f32 %v2420_v59, 0.0 }
 0x840   : > { %v2433_v58 = vmax.f32 %v2415_v5, 0.0  ;;  %3627 = vmatprep.subr.bf16.mxu0 %v3626_v29  ;;  %v3483_v6 = vpop.f32.mrb[56].mxu1 }
 0x841   : > { %v2430_v10 = vadd.f32 %v3483_v6, %v3950_v20  ;;  %3629 = vmatpush3.bf16.msra.mxu0 %v3626_v29  ;;  %v2424_v2 = vpop.f32.mrb[57].mxu1  ;;  %v3720_v20 = vld [vmem:[%s4664_s2 + $0x8] sm:$0xff] }
 0x842   : > { %v3630_v23 = vpack.c.bf16 %v2434_v37, %v2433_v58  ;;  %v2425_v28 = vadd.f32 %v2424_v2, %v3944_v13  ;;  %v3807_v13 = vmov 2  }
 0x843   : > { %v2436_v48 = vmax.f32 %v2430_v10, 0.0  ;;  %3715 = vset.pattern.permute.xlu1 %v3807_v13  ;;  %3716 = vset.pattern.permute.xlu0 %v3807_v13 }
 0x844   : > { %v2435_v54 = vmax.f32 %v2425_v28, 0.0  ;;  %3465 = vmatmul.mubr.msk.f32.vlgmr.msra.gmra.mrb[50].mxu0 %vm357_vm1, %v4047_v16  ;;  %3631 = vmatprep.subr.bf16.mxu1 %v3630_v23 }
 0x845   : > { %3633 = vmatpush3.bf16.msra.mxu1 %v3630_v23  ;;  %3467 = vmatprep.mubr.msk.f32.mxu0 %vm357_vm1, %v4054_v17 }
 0x846   : > { %v3634_v12 = vpack.c.bf16 %v2436_v48, %v2435_v54  ;;  %2640 = vperm.xlu1 %3715, %v3719_v14   ;;  %2644 = vperm.xlu0 %3716, %v3720_v20  }
 0x848   : > { %3468 = vmatmul.mubr.msk.f32.gmra.mrb[52].mxu0 %vm357_vm1, %v4061_v18  ;;  %3635 = vmatprep.subr.bf16.mxu1 %v3634_v12 }
 0x849   : > { %3637 = vmatpush3.bf16.msra.mxu1 %v3634_v12  ;;  %3470 = vmatprep.mubr.msk.f32.mxu0 %vm357_vm1, %v4068_v19 }
 0x84c   : > { %3471 = vmatmul.mubr.msk.f32.gmra.mrb[54].mxu0 %vm357_vm1, %v4075_v21  ;;  %3493 = vmatmul.mubr.msk.f32.vlgmr.msra.gmra.mrb[58].mxu1 %vm357_vm1, %v3957_v30  ;;  %v214_v30 = vld [vmem:[%s4664_s2 + $0x20] sm:$0xff] }
 0x84d   : > { %3473 = vmatprep.mubr.msk.f32.mxu0 %vm357_vm1, %v3978_v33  ;;  %3495 = vmatprep.mubr.msk.f32.mxu1 %vm357_vm1, %v3962_v31  ;;  %v3721_v31 = vld [vmem:[%s4664_s2 + $0x10] sm:$0xff]  ;;  %v3722_v33 = vld [vmem:[%s4664_s2 + $0x18] sm:$0xff] }
 0x84e   : > { %2648 = vperm.xlu1 %3715, %v3721_v31   ;;  %2657 = vperm.xlu0 %3716, %v214_v30  }
 0x850   : > { %3474 = vmatmul.mubr.msk.f32.gmra.mrb[56].mxu0 %vm357_vm1, %v3998_v53  ;;  %3496 = vmatmul.mubr.msk.f32.gmra.mrb[60].mxu1 %vm357_vm1, %v3971_v32  ;;  %v216_v32 = vld [vmem:[%s4664_s2 + $0x30] sm:$0xff]  ;;  %v215_v53 = vld [vmem:[%s4664_s2 + $0x28] sm:$0xff] }
 0x851   : > { %3506 = vmatprep.mubr.msk.f32.mxu0 %vm357_vm1, %v4040_v15  ;;  %v3808_v15 = vmov 3  }
 0x852   : > { %2652 = vperm.xlu1 %3715, %v3722_v33   ;;  %2667 = vperm.xlu0 %3716, %v216_v32  }
 0x856   : > { %2662 = vperm.xlu1 %3715, %v215_v53   ;;  %3717 = vset.pattern.permute.xlu0 %v3808_v15 }
 0x857   : > { %2684 = vperm.xlu0 %3717, %v3719_v14  }
 0x85a   : > { %2672 = vperm.xlu1 %3715, %v217_v46  }
 0x85b   : > { %2696 = vperm.xlu0 %3717, %v3722_v33  }
 0x85e   : > { %3718 = vset.pattern.permute.xlu1 %v3808_v15 }
 0x85f   : > { %2688 = vperm.xlu1 %3718, %v3720_v20   ;;  %2704 = vperm.xlu0 %3717, %v215_v53  }
 0x863   : > { %2692 = vperm.xlu1 %3718, %v3721_v31   ;;  %2712 = vperm.xlu0 %3717, %v217_v46  }
 0x867   : > { %2700 = vperm.xlu1 %3718, %v214_v30  }
 0x86b   : > { %2708 = vperm.xlu1 %3718, %v216_v32  }
 0x917   : > { %v3466_v56 = vpop.f32.mrb[50].mxu0 }
 0x918   : > { %v2339_v45 = vmax.f32 %v2046_v0, %v3466_v56  ;;  %v2299_v50 = vpop.f32.mrb[51].mxu0 }
 0x919   : > { %v2338_v52 = vmax.f32 %v2045_v11, %v2299_v50 }
 0x91b   : > { %v3469_v49 = vpop.f32.mrb[52].mxu0 }
 0x91c   : > { %v4537_v4 = vmax.f32 %v2048_v8, %v3469_v49  ;;  %v2309_v51 = vpop.f32.mrb[53].mxu0 }
 0x91d   : > { %v4542_v59 = vmax.f32 %v2047_v9, %v2309_v51 }
 0x91f   : > { %v3494_v57 = vpop.f32.mrb[58].mxu1  ;;  %v3472_v61 = vpop.f32.mrb[54].mxu0 }
 0x920   : > { %v2509_v39 = vadd.f32 %v3494_v57, %v3984_v35  ;;  %v2503_v0 = vpop.f32.mrb[59].mxu1  ;;  %v4548_v62 = vmax.f32 %v2050_v24, %v3472_v61  ;;  %v2319_v40 = vpop.f32.mrb[55].mxu0 }
 0x921   : > { %v2504_v3 = vadd.f32 %v2503_v0, %v3982_v34  ;;  %v4554_v11 = vmax.f32 %v2049_v43, %v2319_v40 }
 0x922   : > { %v2523_v42 = vmax.f32 %v2509_v39, 0.0 }
 0x923   : > { %v2522_v7 = vmax.f32 %v2504_v3, 0.0  ;;  %v3475_v8 = vpop.f32.mrb[56].mxu0  ;;  %v3497_v27 = vpop.f32.mrb[60].mxu1 }
 0x924   : > { %v4559_v35 = vmax.f32 %v2052_v47, %v3475_v8  ;;  %v2519_v60 = vadd.f32 %v3497_v27, %v3988_v41  ;;  %v2329_v9 = vpop.f32.mrb[57].mxu0  ;;  %v2513_v36 = vpop.f32.mrb[61].mxu1  ;;  %v3723_v41 = vld [vmem:[%s4663_s1 + $0xb0] sm:$0xff] }
 0x925   : > { %v3638_v24 = vpack.c.bf16 %v2523_v42, %v2522_v7  ;;  %v4565_v34 = vmax.f32 %v2051_v55, %v2329_v9  ;;  %v2514_v1 = vadd.f32 %v2513_v36, %v3990_v44  ;;  %v3724_v44 = vld [vmem:[%s4663_s1 + $0xb8] sm:$0xff] }
 0x926   : > { %v2525_v63 = vmax.f32 %v2519_v60, 0.0 }
 0x927   : > { %v2524_v43 = vmax.f32 %v2514_v1, 0.0  ;;  %3639 = vmatprep.subr.bf16.mxu0 %v3638_v24 }
 0x928   : > { %3641 = vmatpush3.bf16.msra.mxu0 %v3638_v24 }
 0x929   : > { %v3642_v29 = vpack.c.bf16 %v2525_v63, %v2524_v43 }
 0x92b   : > { %3643 = vmatprep.subr.bf16.mxu0 %v3642_v29 }
 0x92c   : > { %3645 = vmatpush3.bf16.msra.mxu0 %v3642_v29 }
 0x92f   : > { %3507 = vmatmul.mubr.msk.f32.vlgmr.msra.gmra.mrb[58].mxu0 %vm357_vm1, %v4047_v16  ;;  %v2641_v16 = vpop.permute.xlu1 %2640 }
 0x930   : > { %3509 = vmatprep.mubr.msk.f32.mxu0 %vm357_vm1, %v4054_v17 }
 0x933   : > { %3510 = vmatmul.mubr.msk.f32.gmra.mrb[60].mxu0 %vm357_vm1, %v4061_v18  ;;  %v2649_v17 = vpop.permute.xlu1 %2648  ;;  %v2645_v18 = vpop.permute.xlu0 %2644 }
 0x934   : > { %3512 = vmatprep.mubr.msk.f32.mxu0 %vm357_vm1, %v4068_v19 }
 0x937   : > { %3513 = vmatmul.mubr.msk.f32.gmra.mrb[62].mxu0 %vm357_vm1, %v4075_v21  ;;  %v2653_v19 = vpop.permute.xlu1 %2652  ;;  %v2658_v25 = vpop.permute.xlu0 %2657 }
 0x938   : > { %3515 = vmatprep.mubr.msk.f32.mxu0 %vm357_vm1, %v3723_v41 }
 0x93b   : > { %3516 = vmatmul.mubr.msk.f32.gmra.mrb[64].mxu0 %vm357_vm1, %v3724_v44  ;;  %v2663_v21 = vpop.permute.xlu1 %2662  ;;  %v2668_v22 = vpop.permute.xlu0 %2667 }
 0x93f   : > { %v2673_v38 = vpop.permute.xlu1 %2672  ;;  %v2685_v47 = vpop.permute.xlu0 %2684 }
 0x943   : > { %v2689_v26 = vpop.permute.xlu1 %2688  ;;  %v2697_v23 = vpop.permute.xlu0 %2696 }
 0x947   : > { %v2693_v12 = vpop.permute.xlu1 %2692  ;;  %v2705_v50 = vpop.permute.xlu0 %2704 }
 0x94b   : > { %v2701_v49 = vpop.permute.xlu1 %2700  ;;  %v2713_v8 = vpop.permute.xlu0 %2712 }
 0x94f   : > { %v2709_v27 = vpop.permute.xlu1 %2708 }
 0xa02   : > { %v3508_v55 = vpop.f32.mrb[58].mxu0 }
 0xa03   : > { %v2632_v5 = vmax.f32 %v2339_v45, %v3508_v55  ;;  %v2592_v37 = vpop.f32.mrb[59].mxu0 }
 0xa04   : > { %v2631_v58 = vmax.f32 %v2338_v52, %v2592_v37 }
 0xa05   : > { %v2676_v6 = vmul.f32 %v2645_v18, %v2632_v5 }
 0xa06   : > { %v2675_v10 = vmul.f32 %v2641_v16, %v2631_v58  ;;  %v3511_v2 = vpop.f32.mrb[60].mxu0 }
 0xa07   : > { %v2716_v28 = vadd.f32 %v2689_v26, %v2676_v6  ;;  %v2634_v48 = vmax.f32 %v4537_v4, %v3511_v2  ;;  %v2602_v54 = vpop.f32.mrb[61].mxu0 }
 0xa08   : > { %v2715_v13 = vadd.f32 %v2685_v47, %v2675_v10  ;;  %v2633_v14 = vmax.f32 %v4542_v59, %v2602_v54 }
 0xa09   : > { %v2724_v20 = vmax.f32 %v2716_v28, 0.0  ;;  %v2678_v30 = vmul.f32 %v2653_v19, %v2634_v48 }
 0xa0a   : > { %v2723_v31 = vmax.f32 %v2715_v13, 0.0  ;;  %v2677_v32 = vmul.f32 %v2649_v17, %v2633_v14  ;;  %v3514_v33 = vpop.f32.mrb[62].mxu0 }
 0xa0b   : > { %2732 = vst [vmem:[%s4591_s26 + $0x8] sm:$0xff] %v2724_v20  ;;  %v2718_v53 = vadd.f32 %v2697_v23, %v2678_v30  ;;  %v2636_v15 = vmax.f32 %v4548_v62, %v3514_v33  ;;  %v2612_v46 = vpop.f32.mrb[63].mxu0 }
 0xa0c   : > { %2731 = vst [vmem:[%s4591_s26] sm:$0xff] %v2723_v31  ;;  %v2717_v56 = vadd.f32 %v2693_v12, %v2677_v32  ;;  %v2635_v45 = vmax.f32 %v4554_v11, %v2612_v46 }
 0xa0d   : > { %v2726_v52 = vmax.f32 %v2718_v53, 0.0  ;;  %v2680_v4 = vmul.f32 %v2663_v21, %v2636_v15 }
 0xa0e   : > { %v2725_v51 = vmax.f32 %v2717_v56, 0.0  ;;  %v2679_v59 = vmul.f32 %v2658_v25, %v2635_v45  ;;  %v3517_v57 = vpop.f32.mrb[64].mxu0 }
 0xa0f   : > { %2734 = vst [vmem:[%s4591_s26 + $0x18] sm:$0xff] %v2726_v52  ;;  %v2720_v61 = vadd.f32 %v2705_v50, %v2680_v4  ;;  %v2638_v39 = vmax.f32 %v4559_v35, %v3517_v57  ;;  %v2622_v0 = vpop.f32.mrb[65].mxu0 }
 0xa10   : > { %2733 = vst [vmem:[%s4591_s26 + $0x10] sm:$0xff] %v2725_v51  ;;  %v2719_v62 = vadd.f32 %v2701_v49, %v2679_v59  ;;  %v2637_v40 = vmax.f32 %v4565_v34, %v2622_v0 }
 0xa11   : > { %v2728_v3 = vmax.f32 %v2720_v61, 0.0  ;;  %v2682_v11 = vmul.f32 %v2673_v38, %v2638_v39 }
 0xa12   : > { %v2727_v42 = vmax.f32 %v2719_v62, 0.0  ;;  %v2681_v7 = vmul.f32 %v2668_v22, %v2637_v40 }
 0xa13   : > { %2736 = vst [vmem:[%s4591_s26 + $0x28] sm:$0xff] %v2728_v3  ;;  %v2722_v60 = vadd.f32 %v2713_v8, %v2682_v11 }
 0xa14   : > { %2735 = vst [vmem:[%s4591_s26 + $0x20] sm:$0xff] %v2727_v42  ;;  %v2721_v35 = vadd.f32 %v2709_v27, %v2681_v7 }
 0xa15   : > { %v2730_v9 = vmax.f32 %v2722_v60, 0.0 }
 0xa16   : > { %v2729_v36 = vmax.f32 %v2721_v35, 0.0 }
 0xa17   : > { %2738 = vst [vmem:[%s4591_s26 + $0x38] sm:$0xff] %v2730_v9 }
 0xa18   : > { %2737 = vst [vmem:[%s4591_s26 + $0x30] sm:$0xff] %v2729_v36 }
 0xa19   : > { %3738 = shalt.err (!%p3735_p5)
}
 0xa1a   : > { %s3739_s9 = scalar_lea.hbm %s4608_s4, 1024  ;;  %s3743_s11 = scalar_lea.hbm %s4665_s3, 2048 }
 0xa1b   : > { %p3740_p6 = scmp.ne.s32.totalorder %s4608_s4, %s3739_s9  ;;  %p3744_p10 = scmp.lt.u32.totalorder %s4608_s4, %s4665_s3 }
 0xa1c   : > { %p3745_p11 = scmp.lt.u32.totalorder %s3743_s11, %s3739_s9  ;;  %p3747_p13 = scmp.lt.u32.totalorder %s3739_s9, %s4608_s4 }
 0xa1d   : > { %p3741_p7 = pnand %p3740_p6, %p3872_p4 }
 0xa1e   : > { %p3746_p12 = por %p3745_p11, %p3744_p10 }
 0xa1f   : > { %p3742_p9 = pneg %p3741_p7 }
 0xa20   : > { %p3748_p0 = por %p3747_p13, %p3746_p12 }
 0xa22   : > { %p3749_p1 = pnand %p3748_p0, %p3742_p9 }
 0xa24   : > { %3752 = shalt.err (!%p3749_p1)
}
 0xa25   : > { %s3810_s23 = smov 128   ;;  %s3811_s26 = smov 8  }
 0xa26   : > { %3650 = dma.vmem_to_hbm [thread:$0]  (%p3872_p4), %s4610_s28, 1024, %s4608_s4, %s4616_s15, %s3810_s23, %s3810_s23, %s3811_s26  }
 0xa27 PF: > { %p3656_p2 = scmp.ge.s32.totalorder %s3803_s17, 2  ;;  %s2769_s27 = sand.u32 1, %s3783_s12  }
 0xa28   : > { %s2770_s29 = scalar_lea.sflag [#allocation3], %s2769_s27 }
 0xa29   : > { %p3653_p3 = pnand %p3656_p2, %p3879_p8 }
 0xa2b   : > { %3778 = dma.done.wait (!%p3653_p3), %s2770_s29, 1024  }
 0xa2c   : > { %3780 = vsyncadd (!%p3653_p3), %s2770_s29, 4294966272  ;;  %s16_s17 = sadd.s32 1, %s3803_s17   ;;  %s4670_s12 = smov %s3787_s13 }
 0xa2d   : > { %p13_p5 = scmp.ge.s32.totalorder %s16_s17, 4   ;;  %s4671_s13 = smov %s3791_s14 }
 0xa2e   : > { %s4672_s14 = smov %s3885_s25  ;;  %s4673_s15 = smov %s3799_s16 }
 0xa2f   : > { %s4674_s16 = smov %s4676_s20  ;;  %15 = sbr.rel (!%p13_p5) target bundleno = 4 (0x4), region = 74 }
 0xa36   :  { %2775 = vsyncpa [#allocation3], 1 }
 0xa37   :  { %2777 = vsyncpa [#allocation3 + $0x1], 1 }

</bundles_post_ra>
